<compile_context>
chip_gen: v7x
topology: tpu7x:2x2x1
jax: 0.10.0
libtpu: 0.0.40
codegen_flags: <defaults>
</compile_context>

<pallas_src>
import jax
import jax.numpy as jnp
from jax.experimental import pallas as pl
from jax.experimental.pallas import tpu as pltpu

HIDDEN = 512
LANE = 128


def _round_up(x, m):
    return (x + m - 1) // m * m


def _vmem_budget():
    """Generation-aware (max K-tile, scoped-VMEM request).

    128 MiB-VMEM parts (v5e/v6e): big tiles amortize per-grid-step overhead.
    64 MiB parts (v7x) or unknown backend: conservative budget.
    """
    try:
        info = pltpu.get_tpu_info()
        cap = int(getattr(info, "vmem_capacity_bytes", 64 * 1024 * 1024))
    except Exception:
        cap = 64 * 1024 * 1024
    if cap >= 96 * 1024 * 1024:
        return 16384, 96 * 1024 * 1024   # 32 MiB double-buffered bf16 W1 tile
    return 8192, 48 * 1024 * 1024        # 16 MiB double-buffered bf16 W1 tile


def gsn_kernel(x_ref, w1_ref, b1_ref, w2_ref, b2_ref, w3_ref, b3_ref,
               o_ref, acc_ref):
    """Grid = (B tiles [parallel], K tiles of dense1 [arbitrary reduction])."""
    k = pl.program_id(1)

    @pl.when(k == 0)
    def _():
        acc_ref[...] = jnp.zeros_like(acc_ref)

    # Partial dense1: one fused (tb, tk) x (tk, 512) bf16 matmul per step,
    # accumulated in f32.  Zero-padded K rows/cols contribute nothing.
    acc_ref[...] += jnp.dot(x_ref[...], w1_ref[...],
                            preferred_element_type=jnp.float32)

    @pl.when(k == pl.num_programs(1) - 1)
    def _():
        # dense1 bias + ReLU (f32)
        h1 = jnp.maximum(acc_ref[...] + b1_ref[...], 0.0)
        # dense2 (bf16 weights, f32 accumulate) + bias + ReLU
        h2 = jnp.dot(h1.astype(w2_ref.dtype), w2_ref[...],
                     preferred_element_type=jnp.float32)
        h2 = jnp.maximum(h2 + b2_ref[...], 0.0)
        # dense3 (HIDDEN -> 1) as broadcast-multiply + lane reduction (f32).
        out = jnp.sum(h2 * w3_ref[...], axis=-1, keepdims=True) + b3_ref[...]
        o_ref[...] = out.astype(o_ref.dtype)


def prepare_params(params, *, weight_dtype=jnp.bfloat16, tk=None):
    """One-time conversion of f32 params into the kernel streaming format.

    params = (w1, b1, w2, b2, w3, b3) with weights stored (in, out), i.e.
    transposed relative to torch nn.Linear.weight; w3 is the (1, 512) row.
    W1/W2 are cast to bf16; W1 is zero-padded to a multiple of the K tile
    HERE (not per forward call).  Biases and W3 stay f32.
    """
    w1, b1, w2, b2, w3, b3 = params
    k_in = w1.shape[0]
    assert w1.shape == (k_in, HIDDEN)
    assert w2.shape == (HIDDEN, HIDDEN) and w3.shape == (1, HIDDEN)

    max_tk, vmem_limit = _vmem_budget()
    if tk is None:
        tk = min(_round_up(k_in, LANE), max_tk)
    assert tk % LANE == 0, "K tile must be lane-aligned (multiple of 128)"
    k_padded = _round_up(k_in, tk)

    w1p = w1.astype(weight_dtype)
    if k_padded != k_in:
        w1p = jnp.pad(w1p, ((0, k_padded - k_in), (0, 0)))

    return dict(
        w1=w1p, b1=b1, w2=w2.astype(weight_dtype), b2=b2, w3=w3, b3=b3,
        k_in=k_in, k_padded=k_padded, tk=tk,
        act_dtype=weight_dtype, vmem_limit=vmem_limit,
    )


def _pick_tb(batch):
    """Largest convenient batch tile (multiple of 8) dividing B, else full B."""
    if batch % 8 == 0:
        for cand in (256, 128, 64, 32, 16, 8):
            if batch % cand == 0:
                return cand
    return batch


def global_statistics_network(feature_map, representation, prepared):
    """feature_map: (B, C, H, W), representation: (B, Cc, Hc, Wc) -> (B, 1)."""
    B = feature_map.shape[0]
    fm = feature_map.reshape(B, -1)          # nn.Flatten: C,H,W order
    rep = representation.reshape(B, -1)
    # torch.cat([fm, rep], dim=1): tiny (B, Kc) copy; cast to streaming dtype
    # in the wrapper so the kernel streams bf16 activations.
    x = jnp.concatenate([fm, rep], axis=1).astype(prepared["act_dtype"])
    k_in = x.shape[1]
    assert k_in == prepared["k_in"], "input width does not match prepared W1"

    tk = prepared["tk"]
    k_padded = prepared["k_padded"]
    if k_padded != k_in:                      # cheap: activations only
        x = jnp.pad(x, ((0, 0), (0, k_padded - k_in)))
    n_steps = k_padded // tk

    tb = _pick_tb(B)
    nb = B // tb

    w1, b1, w2, b2, w3, b3 = (prepared[n] for n in
                              ("w1", "b1", "w2", "b2", "w3", "b3"))

    return pl.pallas_call(
        gsn_kernel,
        out_shape=jax.ShapeDtypeStruct((B, 1), jnp.float32),
        grid_spec=pltpu.PrefetchScalarGridSpec(
            num_scalar_prefetch=0,
            grid=(nb, n_steps),
            in_specs=[
                pl.BlockSpec((tb, tk), lambda b, k: (b, k)),           # x
                pl.BlockSpec((tk, HIDDEN), lambda b, k: (k, 0)),       # W1
                pl.BlockSpec((1, HIDDEN), lambda b, k: (0, 0)),        # b1
                pl.BlockSpec((HIDDEN, HIDDEN), lambda b, k: (0, 0)),   # W2
                pl.BlockSpec((1, HIDDEN), lambda b, k: (0, 0)),        # b2
                pl.BlockSpec((1, HIDDEN), lambda b, k: (0, 0)),        # W3 row
                pl.BlockSpec((1, 1), lambda b, k: (0, 0)),             # b3
            ],
            out_specs=pl.BlockSpec((tb, 1), lambda b, k: (b, 0)),
            scratch_shapes=[pltpu.VMEM((tb, HIDDEN), jnp.float32)],
        ),
        compiler_params=pltpu.CompilerParams(
            dimension_semantics=("parallel", "arbitrary"),
            vmem_limit_bytes=prepared["vmem_limit"]),
    )(x, w1, b1, w2, b2, w3, b3)


def init_params(key, in_features):
    """PyTorch-style uniform(-1/sqrt(fan_in), 1/sqrt(fan_in)) init, f32.
    Weights stored transposed relative to nn.Linear: (in, out)."""
    def linear(k, fan_in, fan_out):
        kw, kb = jax.random.split(k)
        bound = 1.0 / jnp.sqrt(fan_in)
        w = jax.random.uniform(kw, (fan_in, fan_out), jnp.float32, -bound, bound)
        b = jax.random.uniform(kb, (1, fan_out), jnp.float32, -bound, bound)
        return w, b

    k1, k2, k3 = jax.random.split(key, 3)
    w1, b1 = linear(k1, in_features, HIDDEN)
    w2, b2 = linear(k2, HIDDEN, HIDDEN)
    w3t, b3 = linear(k3, HIDDEN, 1)
    w3 = w3t.T                      # (1, HIDDEN) row for lane reduction
    b3 = b3.reshape(1, 1)
    return (w1, b1, w2, b2, w3, b3)


def reference(feature_map, representation, params):
    """Pure-JAX f32 reference of the PyTorch forward."""
    w1, b1, w2, b2, w3, b3 = params
    B = feature_map.shape[0]
    x = jnp.concatenate([feature_map.reshape(B, -1),
                         representation.reshape(B, -1)], axis=1)
    h = jnp.maximum(x @ w1 + b1, 0.0)
    h = jnp.maximum(h @ w2 + b2, 0.0)
    return h @ w3.T + b3


if __name__ == "__main__":
    # Small shapes consistent with the module:
    #   feature_map_size=16, feature_map_channels=4 -> flat = 4*16*16 = 1024
    #   coding_channels=16, coding_size=8           -> flat = 16*8*8  = 1024
    #   dense1 in_features = 2048
    B, C, H, W = 2, 4, 16, 16
    CC, CS = 16, 8

    key = jax.random.PRNGKey(0)
    k_fm, k_rep, k_params = jax.random.split(key, 3)

    feature_map = jax.random.normal(k_fm, (B, C, H, W), jnp.float32)
    representation = jax.random.normal(k_rep, (B, CC, CS, CS), jnp.float32)

    in_features = C * H * W + CC * CS * CS      # 2048
    params = init_params(k_params, in_features)
    prepared = prepare_params(params)           # bf16 W1/W2 padded once here

    out = global_statistics_network(feature_map, representation, prepared)
    out = jax.block_until_ready(out)

    ref = reference(feature_map, representation, params)
    assert out.shape == (B, 1)
    # bf16 weight/activation streaming: loosened tolerance vs f32 reference.
    assert jnp.allclose(out, ref, atol=2e-2, rtol=2e-2), (out, ref)

    print("KERNEL_OK")
</pallas_src>

<mosaic_0001>
module attributes {stable_mosaic.version = 11 : i64} {
  func.func @gsn_kernel(%arg0: i32, %arg1: i32, %arg2: memref<2x2048xbf16, #tpu.memory_space<vmem>>, %arg3: memref<2048x512xbf16, #tpu.memory_space<vmem>>, %arg4: memref<1x512xf32, #tpu.memory_space<vmem>>, %arg5: memref<512x512xbf16, #tpu.memory_space<vmem>>, %arg6: memref<1x512xf32, #tpu.memory_space<vmem>>, %arg7: memref<1x512xf32, #tpu.memory_space<vmem>>, %arg8: memref<1x1xf32, #tpu.memory_space<vmem>>, %arg9: memref<2x1xf32, #tpu.memory_space<vmem>>, %arg10: memref<2x512xf32, #tpu.memory_space<vmem>>) attributes {dimension_semantics = [#tpu.dimension_semantics<parallel>, #tpu.dimension_semantics<arbitrary>], iteration_bounds = array<i64: 1, 1>, scalar_prefetch = 0 : i64, scratch_operands = 1 : i64, tpu.core_type = #tpu.core_type<tc>, window_params = [{transform_indices = @transform_0, window_bounds = array<i64: 2, 2048>}, {transform_indices = @transform_1, window_bounds = array<i64: 2048, 512>}, {pipeline_mode = #tpu.pipeline_mode<synchronous>, transform_indices = @transform_2, window_bounds = array<i64: 1, 512>}, {pipeline_mode = #tpu.pipeline_mode<synchronous>, transform_indices = @transform_3, window_bounds = array<i64: 512, 512>}, {pipeline_mode = #tpu.pipeline_mode<synchronous>, transform_indices = @transform_4, window_bounds = array<i64: 1, 512>}, {pipeline_mode = #tpu.pipeline_mode<synchronous>, transform_indices = @transform_5, window_bounds = array<i64: 1, 512>}, {pipeline_mode = #tpu.pipeline_mode<synchronous>, transform_indices = @transform_6, window_bounds = array<i64: 1, 1>}, {transform_indices = @transform_7, window_bounds = array<i64: 2, 1>}]} {
    %c0_i32 = arith.constant 0 : i32
    %0 = arith.cmpi eq, %arg1, %c0_i32 : i32
    %1 = arith.extui %0 : i1 to i32
    %c0_i32_0 = arith.constant 0 : i32
    %2 = arith.cmpi ne, %1, %c0_i32_0 : i32
    scf.if %2 {
      %cst_10 = arith.constant 0.000000e+00 : f32
      %12 = vector.broadcast %cst_10 : f32 to vector<2x512xf32>
      %c0_11 = arith.constant 0 : index
      %c0_12 = arith.constant 0 : index
      %13 = vector.load %arg10[%c0_11, %c0_12] : memref<2x512xf32, #tpu.memory_space<vmem>>, vector<2x512xf32>
      tpu.vector_store %arg10[%c0_11, %c0_12], %12 {strides = array<i32>} : memref<2x512xf32, #tpu.memory_space<vmem>>, vector<2x512xf32>,
    } else {
    }
    %c0 = arith.constant 0 : index
    %c0_1 = arith.constant 0 : index
    %3 = vector.load %arg10[%c0, %c0_1] : memref<2x512xf32, #tpu.memory_space<vmem>>, vector<2x512xf32>
    %c0_2 = arith.constant 0 : index
    %c0_3 = arith.constant 0 : index
    %4 = vector.load %arg2[%c0_2, %c0_3] : memref<2x2048xbf16, #tpu.memory_space<vmem>>, vector<2x2048xbf16>
    %c0_4 = arith.constant 0 : index
    %c0_5 = arith.constant 0 : index
    %5 = vector.load %arg3[%c0_4, %c0_5] : memref<2048x512xbf16, #tpu.memory_space<vmem>>, vector<2048x512xbf16>
    %cst = arith.constant dense<0.000000e+00> : vector<2x512xf32>
    %6 = tpu.matmul %4, %5, %cst {dimension_numbers = #tpu.dot_dimension_numbers<[1], [0], [0], [1], [0, 0, 1, 1], [], []>} : vector<2x2048xbf16>, vector<2048x512xbf16>, vector<2x512xf32> -> vector<2x512xf32>
    %7 = arith.addf %3, %6 : vector<2x512xf32>
    %c0_6 = arith.constant 0 : index
    %c0_7 = arith.constant 0 : index
    %8 = vector.load %arg10[%c0_6, %c0_7] : memref<2x512xf32, #tpu.memory_space<vmem>>, vector<2x512xf32>
    tpu.vector_store %arg10[%c0_6, %c0_7], %7 {strides = array<i32>} : memref<2x512xf32, #tpu.memory_space<vmem>>, vector<2x512xf32>,
    %c0_i32_8 = arith.constant 0 : i32
    %9 = arith.cmpi eq, %arg1, %c0_i32_8 : i32
    %10 = arith.extui %9 : i1 to i32
    %c0_i32_9 = arith.constant 0 : i32
    %11 = arith.cmpi ne, %10, %c0_i32_9 : i32
    scf.if %11 {
      %c0_10 = arith.constant 0 : index
      %c0_11 = arith.constant 0 : index
      %12 = vector.load %arg10[%c0_10, %c0_11] : memref<2x512xf32, #tpu.memory_space<vmem>>, vector<2x512xf32>
      %c0_12 = arith.constant 0 : index
      %c0_13 = arith.constant 0 : index
      %13 = vector.load %arg4[%c0_12, %c0_13] : memref<1x512xf32, #tpu.memory_space<vmem>>, vector<1x512xf32>
      %14 = vector.broadcast %13 : vector<1x512xf32> to vector<2x512xf32>
      %15 = arith.addf %12, %14 : vector<2x512xf32>
      %cst_14 = arith.constant 0.000000e+00 : f32
      %16 = vector.broadcast %cst_14 : f32 to vector<2x512xf32>
      %17 = arith.maximumf %15, %16 : vector<2x512xf32>
      %18 = arith.truncf %17 : vector<2x512xf32> to vector<2x512xbf16>
      %c0_15 = arith.constant 0 : index
      %c0_16 = arith.constant 0 : index
      %19 = vector.load %arg5[%c0_15, %c0_16] : memref<512x512xbf16, #tpu.memory_space<vmem>>, vector<512x512xbf16>
      %cst_17 = arith.constant dense<0.000000e+00> : vector<2x512xf32>
      %20 = tpu.matmul %18, %19, %cst_17 {dimension_numbers = #tpu.dot_dimension_numbers<[1], [0], [0], [1], [0, 0, 1, 1], [], []>} : vector<2x512xbf16>, vector<512x512xbf16>, vector<2x512xf32> -> vector<2x512xf32>
      %c0_18 = arith.constant 0 : index
      %c0_19 = arith.constant 0 : index
      %21 = vector.load %arg6[%c0_18, %c0_19] : memref<1x512xf32, #tpu.memory_space<vmem>>, vector<1x512xf32>
      %22 = vector.broadcast %21 : vector<1x512xf32> to vector<2x512xf32>
      %23 = arith.addf %20, %22 : vector<2x512xf32>
      %cst_20 = arith.constant 0.000000e+00 : f32
      %24 = vector.broadcast %cst_20 : f32 to vector<2x512xf32>
      %25 = arith.maximumf %23, %24 : vector<2x512xf32>
      %c0_21 = arith.constant 0 : index
      %c0_22 = arith.constant 0 : index
      %26 = vector.load %arg7[%c0_21, %c0_22] : memref<1x512xf32, #tpu.memory_space<vmem>>, vector<1x512xf32>
      %27 = vector.broadcast %26 : vector<1x512xf32> to vector<2x512xf32>
      %28 = arith.mulf %25, %27 : vector<2x512xf32>
      %cst_23 = arith.constant dense<0.000000e+00> : vector<2xf32>
      %29 = vector.multi_reduction <add>, %28, %cst_23 [1] : vector<2x512xf32> to vector<2xf32>
      %30 = vector.shape_cast %29 : vector<2xf32> to vector<2x1xf32>
      %c0_24 = arith.constant 0 : index
      %c0_25 = arith.constant 0 : index
      %31 = vector.load %arg8[%c0_24, %c0_25] : memref<1x1xf32, #tpu.memory_space<vmem>>, vector<1x1xf32>
      %32 = vector.broadcast %31 : vector<1x1xf32> to vector<2x1xf32>
      %33 = arith.addf %30, %32 : vector<2x1xf32>
      %c0_26 = arith.constant 0 : index
      %c0_27 = arith.constant 0 : index
      %34 = vector.load %arg9[%c0_26, %c0_27] : memref<2x1xf32, #tpu.memory_space<vmem>>, vector<2x1xf32>
      tpu.vector_store %arg9[%c0_26, %c0_27], %33 {strides = array<i32>} : memref<2x1xf32, #tpu.memory_space<vmem>>, vector<2x1xf32>,
    } else {
    }
    return
  }
  func.func @transform_0(%arg0: i32, %arg1: i32) -> (i32, i32) {
    %c0_i32 = arith.constant 0 : i32
    return %arg0, %arg1 : i32, i32
  }
  func.func @transform_1(%arg0: i32, %arg1: i32) -> (i32, i32) {
    %c0_i32 = arith.constant 0 : i32
    %c0_i32_0 = arith.constant 0 : i32
    return %arg1, %c0_i32 : i32, i32
  }
  func.func @transform_2(%arg0: i32, %arg1: i32) -> (i32, i32) {
    %c0_i32 = arith.constant 0 : i32
    %c0_i32_0 = arith.constant 0 : i32
    %c0_i32_1 = arith.constant 0 : i32
    return %c0_i32, %c0_i32_0 : i32, i32
  }
  func.func @transform_3(%arg0: i32, %arg1: i32) -> (i32, i32) {
    %c0_i32 = arith.constant 0 : i32
    %c0_i32_0 = arith.constant 0 : i32
    %c0_i32_1 = arith.constant 0 : i32
    return %c0_i32, %c0_i32_0 : i32, i32
  }
  func.func @transform_4(%arg0: i32, %arg1: i32) -> (i32, i32) {
    %c0_i32 = arith.constant 0 : i32
    %c0_i32_0 = arith.constant 0 : i32
    %c0_i32_1 = arith.constant 0 : i32
    return %c0_i32, %c0_i32_0 : i32, i32
  }
  func.func @transform_5(%arg0: i32, %arg1: i32) -> (i32, i32) {
    %c0_i32 = arith.constant 0 : i32
    %c0_i32_0 = arith.constant 0 : i32
    %c0_i32_1 = arith.constant 0 : i32
    return %c0_i32, %c0_i32_0 : i32, i32
  }
  func.func @transform_6(%arg0: i32, %arg1: i32) -> (i32, i32) {
    %c0_i32 = arith.constant 0 : i32
    %c0_i32_0 = arith.constant 0 : i32
    %c0_i32_1 = arith.constant 0 : i32
    return %c0_i32, %c0_i32_0 : i32, i32
  }
  func.func @transform_7(%arg0: i32, %arg1: i32) -> (i32, i32) {
    %c0_i32 = arith.constant 0 : i32
    %c0_i32_0 = arith.constant 0 : i32
    return %arg0, %c0_i32 : i32, i32
  }
}

</mosaic_0001>

<bundles_post_ra>
// kernel: tpu_custom_call.1
= control target key start
LH: loop header
LB: loop body
LE: loop exit
PB: predicated region body
PF: predicated region fallthrough
CT: control target
= control target key end

     0   :  { %s7118_s0 = inlined_call_operand.hbm [shape: bf16[2,2048], index: 0, kind: input, shape index: {}]   ;;  %s7119_s1 = inlined_call_operand.hbm [shape: bf16[2048,512], index: 1, kind: input, shape index: {}]   ;;  %s7120_s2 = inlined_call_operand.hbm [shape: f32[1,512], index: 2, kind: input, shape index: {}]   ;;  %s7121_s3 = inlined_call_operand.hbm [shape: bf16[512,512], index: 3, kind: input, shape index: {}]   ;;  %s7122_s4 = inlined_call_operand.hbm [shape: f32[1,512], index: 4, kind: input, shape index: {}]   ;;  %s7123_s5 = inlined_call_operand.hbm [shape: f32[1,512], index: 5, kind: input, shape index: {}]   ;;  %s7124_s6 = inlined_call_operand.<no memory space> [shape: f32[1,1], index: 6, kind: input, shape index: {}]   ;;  %s7125_s7 = inlined_call_operand.vmem [shape: f32[2,1], index: 7, kind: output, shape index: {}]  }
   0x1   :  { %v12_v0 = vstv %s7124_s6 }
   0x2   :  { %13 = vst [vmem:[#allocation3] sm:$0x1] %v12_v0 }
   0x3   :  { %14 = vsyncpa [#allocation5], 0 }
   0x4   :  { %15 = vsyncpa [#allocation7], 0 }
   0x5   :  { %16 = vsyncpa [#allocation10], 0 }
   0x6   :  { %17 = vsyncpa [#allocation13], 0  ;;  %s6881_s26 = smov [#allocation6]   ;;  %s6741_s30 = scalar_lea.hbm %s7119_s1, 65536 }
   0x7   :  { %s33_s27 = sshll.u32 %s6881_s26, 4  ;;  %p6742_p0 = scmp.ne.s32.totalorder %s7119_s1, %s6741_s30  ;;  %s34_s27 = int_to_ptr.vmem [resolvable:$true] %s33_s27 }
   0x8   :  { %p6745_p1 = scmp.lt.u32.totalorder %s6741_s30, %s7119_s1 }
   0xa   :  { %p6747_p2 = pnand %p6745_p1, %p6742_p0 }
   0xc   :  { %6750 = shalt.err (!%p6747_p2)
}
   0xd   :  { %s6751_s6 = scalar_lea.vmem %s34_s27, 65536  ;;  %p6756_p4 = scmp.lt.s32.totalorder %s34_s27, %s34_s27 }
   0xe   :  { %p6752_p3 = scmp.ne.s32.totalorder %s34_s27, %s6751_s6  ;;  %p6757_p5 = scmp.lt.s32.totalorder %s6751_s6, %s6751_s6 }
  0x10   :  { %p6758_p6 = por %p6757_p5, %p6756_p4 }
  0x12   :  { %p6759_p7 = pnand %p6758_p6, %p6752_p3 }
  0x14   :  { %6762 = shalt.err (!%p6759_p7)
}
  0x15   :  { %s6882_s12 = smov 256   ;;  %s6883_s13 = smov 16  }
  0x16   :  { %39 = dma.hbm_to_vmem [thread:$0]  %s7119_s1, 65536, %s34_s27, [#allocation7], %s6882_s12, %s6882_s12, %s6883_s13  }
  0x17   :  { %s6884_s16 = smov [#allocation9]   ;;  %s6885_s18 = smov [#allocation4]  }
  0x18   :  { %s55_s17 = sshll.u32 %s6884_s16, 4  ;;  %s24_s19 = sshll.u32 %s6885_s18, 4  ;;  %s56_s17 = int_to_ptr.vmem [resolvable:$true] %s55_s17  ;;  %s25_s19 = int_to_ptr.vmem [resolvable:$true] %s24_s19 }
  0x19   :  { %s6763_s22 = scalar_lea.hbm %s7121_s3, 16384 }
  0x1a   :  { %p6764_p8 = scmp.ne.s32.totalorder %s7121_s3, %s6763_s22  ;;  %p6767_p9 = scmp.lt.u32.totalorder %s6763_s22, %s7121_s3 }
  0x1c   :  { %p6769_p10 = pnand %p6767_p9, %p6764_p8 }
  0x1e   :  { %6772 = shalt.err (!%p6769_p10)
}
  0x1f   :  { %s6773_s1 = scalar_lea.vmem %s56_s17, 16384  ;;  %p6778_p12 = scmp.lt.s32.totalorder %s56_s17, %s56_s17 }
  0x20   :  { %p6774_p11 = scmp.ne.s32.totalorder %s56_s17, %s6773_s1  ;;  %p6779_p13 = scmp.lt.s32.totalorder %s6773_s1, %s6773_s1 }
  0x22   :  { %p6780_p0 = por %p6779_p13, %p6778_p12 }
  0x24   :  { %p6781_p1 = pnand %p6780_p0, %p6774_p11 }
  0x26   :  { %6784 = shalt.err (!%p6781_p1)
}
  0x27   :  { %61 = dma.hbm_to_vmem [thread:$0]  %s7121_s3, 16384, %s56_s17, [#allocation10], %s6882_s12, %s6882_s12, %s6883_s13  }
  0x28   :  { %s6785_s8 = scalar_lea.hbm %s7118_s0, 256 }
  0x29   :  { %p6786_p2 = scmp.ne.s32.totalorder %s7118_s0, %s6785_s8  ;;  %p6789_p3 = scmp.lt.u32.totalorder %s6785_s8, %s7118_s0 }
  0x2b   :  { %p6791_p4 = pnand %p6789_p3, %p6786_p2 }
  0x2d   :  { %6794 = shalt.err (!%p6791_p4)
}
  0x2e   :  { %s6795_s14 = scalar_lea.vmem %s25_s19, 256  ;;  %p6800_p6 = scmp.lt.s32.totalorder %s25_s19, %s25_s19 }
  0x2f   :  { %p6796_p5 = scmp.ne.s32.totalorder %s25_s19, %s6795_s14  ;;  %p6801_p7 = scmp.lt.s32.totalorder %s6795_s14, %s6795_s14 }
  0x31   :  { %p6802_p8 = por %p6801_p7, %p6800_p6 }
  0x33   :  { %p6803_p9 = pnand %p6802_p8, %p6796_p5 }
  0x35   :  { %6806 = shalt.err (!%p6803_p9)
}
  0x36   :  { %27 = dma.hbm_to_vmem [thread:$0]  %s7118_s0, 256, %s25_s19, [#allocation5]  }
  0x37   :  { %s6886_s13 = smov [#allocation8]   ;;  %s6887_s16 = smov [#allocation11]  }
  0x38   :  { %s46_s15 = sshll.u32 %s6886_s13, 4  ;;  %s68_s17 = sshll.u32 %s6887_s16, 4  ;;  %s47_s15 = int_to_ptr.vmem [resolvable:$true] %s46_s15  ;;  %s69_s17 = int_to_ptr.vmem [resolvable:$true] %s68_s17 }
  0x39   :  { %s6807_s21 = scalar_lea.hbm %s7120_s2, 64 }
  0x3a   :  { %p6808_p10 = scmp.ne.s32.totalorder %s7120_s2, %s6807_s21  ;;  %p6811_p11 = scmp.lt.u32.totalorder %s6807_s21, %s7120_s2 }
  0x3c   :  { %p6813_p12 = pnand %p6811_p11, %p6808_p10 }
  0x3e   :  { %6816 = shalt.err (!%p6813_p12)
}
  0x3f   :  { %s6817_s0 = scalar_lea.vmem %s47_s15, 64  ;;  %p6822_p0 = scmp.lt.s32.totalorder %s47_s15, %s47_s15 }
  0x40   :  { %p6818_p13 = scmp.ne.s32.totalorder %s47_s15, %s6817_s0  ;;  %p6823_p1 = scmp.lt.s32.totalorder %s6817_s0, %s6817_s0 }
  0x42   :  { %p6824_p2 = por %p6823_p1, %p6822_p0 }
  0x44   :  { %p6825_p3 = pnand %p6824_p2, %p6818_p13 }
  0x46   :  { %6828 = shalt.err (!%p6825_p3)
}
  0x47   :  { %49 = dma.hbm_to_vmem [thread:$0]  %s7120_s2, 64, %s47_s15, [#allocation7]  }
  0x48   :  { %s6829_s28 = scalar_lea.hbm %s7122_s4, 64 }
  0x49   :  { %p6830_p4 = scmp.ne.s32.totalorder %s7122_s4, %s6829_s28  ;;  %p6833_p5 = scmp.lt.u32.totalorder %s6829_s28, %s7122_s4 }
  0x4b   :  { %p6835_p6 = pnand %p6833_p5, %p6830_p4 }
  0x4d   :  { %6838 = shalt.err (!%p6835_p6)
}
  0x4e   :  { %s6839_s10 = scalar_lea.vmem %s69_s17, 64  ;;  %p6844_p8 = scmp.lt.s32.totalorder %s69_s17, %s69_s17 }
  0x4f   :  { %p6840_p7 = scmp.ne.s32.totalorder %s69_s17, %s6839_s10  ;;  %p6845_p9 = scmp.lt.s32.totalorder %s6839_s10, %s6839_s10 }
  0x51   :  { %p6846_p10 = por %p6845_p9, %p6844_p8 }
  0x53   :  { %p6847_p11 = pnand %p6846_p10, %p6840_p7 }
  0x55   :  { %6850 = shalt.err (!%p6847_p11)
}
  0x56   :  { %71 = dma.hbm_to_vmem [thread:$0]  %s7122_s4, 64, %s69_s17, [#allocation10]  }
  0x57   :  { %s6888_s6 = smov [#allocation12]   ;;  %s6851_s13 = scalar_lea.hbm %s7123_s5, 64 }
  0x58   :  { %s78_s14 = sshll.u32 %s6888_s6, 4  ;;  %p6852_p12 = scmp.ne.s32.totalorder %s7123_s5, %s6851_s13  ;;  %s79_s14 = int_to_ptr.vmem [resolvable:$true] %s78_s14 }
  0x59   :  { %p6855_p13 = scmp.lt.u32.totalorder %s6851_s13, %s7123_s5 }
  0x5b   :  { %p6857_p0 = pnand %p6855_p13, %p6852_p12 }
  0x5d   :  { %6860 = shalt.err (!%p6857_p0)
}
  0x5e   :  { %s6861_s21 = scalar_lea.vmem %s79_s14, 64  ;;  %p6866_p2 = scmp.lt.s32.totalorder %s79_s14, %s79_s14 }
  0x5f   :  { %p6862_p1 = scmp.ne.s32.totalorder %s79_s14, %s6861_s21  ;;  %p6867_p3 = scmp.lt.s32.totalorder %s6861_s21, %s6861_s21 }
  0x61   :  { %p6868_p4 = por %p6867_p3, %p6866_p2 }
  0x63   :  { %p6869_p5 = pnand %p6868_p4, %p6862_p1 }
  0x65   :  { %6872 = shalt.err (!%p6869_p5)
}
  0x66   :  { %81 = dma.hbm_to_vmem [thread:$0]  %s7123_s5, 64, %s79_s14, [#allocation13]  }
  0x67   :  { %6873 = dma.done.wait [#allocation5], 256  }
  0x68   :  { %6874 = vsyncadd [#allocation5], 4294967040 }
  0x69   :  { %6875 = dma.done.wait [#allocation7], 65600  }
  0x6a   :  { %6876 = vsyncadd [#allocation7], 4294901696 }
  0x6b   :  { %6877 = dma.done.wait [#allocation10], 16448  }
  0x6c   :  { %6878 = vsyncadd [#allocation10], 4294950848 }
  0x6d   :  { %6879 = dma.done.wait [#allocation13], 64  }
  0x6e   :  { %6880 = vsyncadd [#allocation13], 4294967232  ;;  %v5777_v1 = vld [vmem:[#allocation6 + $0x4] ss:$16 sps:$4 sm:$0xff]   ;;  %v5779_v2 = vld [vmem:[#allocation6 + $0xc] ss:$16 sps:$4 sm:$0xff]   ;;  %v628_v39 = vlaneseq }
  0x6f   :  { %3298 = vmatprep.subr.bf16.mxu0 %v5777_v1  ;;  %v5781_v3 = vld [vmem:[#allocation6] ss:$16 sps:$4 sm:$0xff]   ;;  %v5782_v4 = vld [vmem:[#allocation6 + $0x8] ss:$16 sps:$4 sm:$0xff]   ;;  %3626 = vmatprep.subr.bf16.mxu1 %v5779_v2  ;;  %v5783_v5 = vld [vmem:[#allocation6 + $0x24] ss:$16 sps:$4 sm:$0xff]  }
  0x70   :  { %3299 = vmatpush1.bf16.msra.mxu0 %v5781_v3  ;;  %3627 = vmatpush1.bf16.msra.mxu1 %v5782_v4  ;;  %v5785_v6 = vld [vmem:[#allocation6 + $0x2c] ss:$16 sps:$4 sm:$0xff]   ;;  %v5787_v7 = vld [vmem:[#allocation6 + $0x20] ss:$16 sps:$4 sm:$0xff]   ;;  %v5788_v8 = vld [vmem:[#allocation6 + $0x28] ss:$16 sps:$4 sm:$0xff]  }
  0x71   :  { %3300 = vmatprep.subr.bf16.mxu0 %v5783_v5  ;;  %3628 = vmatprep.subr.bf16.mxu1 %v5785_v6  ;;  %v5789_v9 = vld [vmem:[#allocation6 + $0x44] ss:$16 sps:$4 sm:$0xff]   ;;  %v5791_v10 = vld [vmem:[#allocation6 + $0x4c] ss:$16 sps:$4 sm:$0xff]   ;;  %v5793_v11 = vld [vmem:[#allocation6 + $0x40] ss:$16 sps:$4 sm:$0xff]  }
  0x72   :  { %v5794_v12 = vld [vmem:[#allocation6 + $0x48] ss:$16 sps:$4 sm:$0xff]   ;;  %v5795_v13 = vld [vmem:[#allocation6 + $0x64] ss:$16 sps:$4 sm:$0xff]   ;;  %v5797_v14 = vld [vmem:[#allocation6 + $0x6c] ss:$16 sps:$4 sm:$0xff]  }
  0x73   :  { %v5799_v15 = vld [vmem:[#allocation6 + $0x60] ss:$16 sps:$4 sm:$0xff]   ;;  %v5800_v16 = vld [vmem:[#allocation6 + $0x68] ss:$16 sps:$4 sm:$0xff]   ;;  %v5801_v17 = vld [vmem:[#allocation6 + $0x84] ss:$16 sps:$4 sm:$0xff]  }
  0x74   :  { %3301 = vmatpush1.bf16.msra.mxu0 %v5787_v7  ;;  %3629 = vmatpush1.bf16.msra.mxu1 %v5788_v8  ;;  %v5803_v18 = vld [vmem:[#allocation6 + $0x8c] ss:$16 sps:$4 sm:$0xff]   ;;  %v5805_v19 = vld [vmem:[#allocation6 + $0x80] ss:$16 sps:$4 sm:$0xff]   ;;  %v5806_v20 = vld [vmem:[#allocation6 + $0x88] ss:$16 sps:$4 sm:$0xff]  }
  0x75   :  { %3302 = vmatprep.subr.bf16.mxu0 %v5789_v9  ;;  %3630 = vmatprep.subr.bf16.mxu1 %v5791_v10  ;;  %v5807_v21 = vld [vmem:[#allocation6 + $0xa4] ss:$16 sps:$4 sm:$0xff]   ;;  %v5809_v22 = vld [vmem:[#allocation6 + $0xac] ss:$16 sps:$4 sm:$0xff]   ;;  %v5811_v23 = vld [vmem:[#allocation6 + $0xa0] ss:$16 sps:$4 sm:$0xff]  }
  0x76   :  { %v5812_v24 = vld [vmem:[#allocation6 + $0xa8] ss:$16 sps:$4 sm:$0xff]   ;;  %v5813_v25 = vld [vmem:[#allocation6 + $0xc4] ss:$16 sps:$4 sm:$0xff]   ;;  %v5815_v26 = vld [vmem:[#allocation6 + $0xcc] ss:$16 sps:$4 sm:$0xff]  }
  0x77   :  { %v5817_v27 = vld [vmem:[#allocation6 + $0xc0] ss:$16 sps:$4 sm:$0xff]   ;;  %v5818_v28 = vld [vmem:[#allocation6 + $0xc8] ss:$16 sps:$4 sm:$0xff]   ;;  %v5819_v29 = vld [vmem:[#allocation6 + $0xe4] ss:$16 sps:$4 sm:$0xff]  }
  0x78   :  { %3303 = vmatpush1.bf16.msra.mxu0 %v5793_v11  ;;  %3631 = vmatpush1.bf16.msra.mxu1 %v5794_v12  ;;  %v5821_v30 = vld [vmem:[#allocation6 + $0xec] ss:$16 sps:$4 sm:$0xff]   ;;  %v5823_v31 = vld [vmem:[#allocation6 + $0xe0] ss:$16 sps:$4 sm:$0xff]   ;;  %v5824_v32 = vld [vmem:[#allocation6 + $0xe8] ss:$16 sps:$4 sm:$0xff]  }
  0x79   :  { %3304 = vmatprep.subr.bf16.mxu0 %v5795_v13  ;;  %3632 = vmatprep.subr.bf16.mxu1 %v5797_v14  ;;  %v5825_v33 = vld [vmem:[#allocation6 + $0x104] ss:$16 sps:$4 sm:$0xff]   ;;  %v5827_v34 = vld [vmem:[#allocation6 + $0x10c] ss:$16 sps:$4 sm:$0xff]   ;;  %v5829_v35 = vld [vmem:[#allocation6 + $0x100] ss:$16 sps:$4 sm:$0xff]  }
  0x7a   :  { %v5830_v36 = vld [vmem:[#allocation6 + $0x108] ss:$16 sps:$4 sm:$0xff]   ;;  %v6889_v37 = vmov 1966171168   ;;  %v5831_v40 = vld [vmem:[#allocation6 + $0x124] ss:$16 sps:$4 sm:$0xff]  }
  0x7b   :  { %v626_v38 = vunpack.c.l.s4 %v6889_v37  ;;  %v5833_v41 = vld [vmem:[#allocation6 + $0x12c] ss:$16 sps:$4 sm:$0xff]   ;;  %v5835_v42 = vld [vmem:[#allocation6 + $0x120] ss:$16 sps:$4 sm:$0xff]   ;;  %v7006_v44 = vshrl.u32 %v628_v39, 7  ;;  %vm5030_vm0 = vcmask 1041408  }
  0x7c   :  { %3305 = vmatpush1.bf16.msra.mxu0 %v5799_v15  ;;  %3633 = vmatpush1.bf16.msra.mxu1 %v5800_v16  ;;  %v5836_v45 = vld [vmem:[#allocation6 + $0x128] ss:$16 sps:$4 sm:$0xff]   ;;  %v5837_v46 = vld [vmem:[#allocation6 + $0x144] ss:$16 sps:$4 sm:$0xff]   ;;  %v5839_v47 = vld [vmem:[#allocation6 + $0x14c] ss:$16 sps:$4 sm:$0xff]  }
  0x7d   :  { %3306 = vmatprep.subr.bf16.mxu0 %v5801_v17  ;;  %3634 = vmatprep.subr.bf16.mxu1 %v5803_v18  ;;  %v627_v43 = vunpack.c.0.s8 %v626_v38  ;;  %v5841_v48 = vld [vmem:[#allocation6 + $0x140] ss:$16 sps:$4 sm:$0xff]   ;;  %v5842_v49 = vld [vmem:[#allocation6 + $0x148] ss:$16 sps:$4 sm:$0xff]   ;;  %v5843_v51 = vld [vmem:[#allocation6 + $0x164] ss:$16 sps:$4 sm:$0xff]  }
  0x7e   :  { %v5845_v52 = vld [vmem:[#allocation6 + $0x16c] ss:$16 sps:$4 sm:$0xff]   ;;  %v7011_v53 = vld [vmem:[#allocation4] sm:$0xff]  ;;  %v5848_v56 = vld [vmem:[#allocation6 + $0x168] ss:$16 sps:$4 sm:$0xff]   ;;  %vm5048_vm1 = vcmask 1024  }
  0x7f   :  { %v7009_v50 = vsub.s32 %v627_v43, %v7006_v44  ;;  %v5847_v54 = vld [vmem:[#allocation6 + $0x160] ss:$16 sps:$4 sm:$0xff]   ;;  %v5849_v57 = vld [vmem:[#allocation6 + $0x184] ss:$16 sps:$4 sm:$0xff]   ;;  %v5851_v58 = vld [vmem:[#allocation6 + $0x18c] ss:$16 sps:$4 sm:$0xff]  }
  0x80   :  { %3307 = vmatpush1.bf16.msra.mxu0 %v5805_v19  ;;  %3635 = vmatpush1.bf16.msra.mxu1 %v5806_v20  ;;  %v5853_v60 = vld [vmem:[#allocation6 + $0x180] ss:$16 sps:$4 sm:$0xff]   ;;  %v5854_v62 = vld [vmem:[#allocation6 + $0x188] ss:$16 sps:$4 sm:$0xff]   ;;  %v5855_v63 = vld [vmem:[#allocation6 + $0x1a4] ss:$16 sps:$4 sm:$0xff]  }
  0x81   :  { %3308 = vmatprep.subr.bf16.mxu0 %v5807_v21  ;;  %3636 = vmatprep.subr.bf16.mxu1 %v5809_v22  ;;  %v631_v55 = vrot.slane %v7011_v53, %v7009_v50  ;;  %v5857_v0 = vld [vmem:[#allocation6 + $0x1ac] ss:$16 sps:$4 sm:$0xff]   ;;  %v5859_v1 = vld [vmem:[#allocation6 + $0x1a0] ss:$16 sps:$4 sm:$0xff]   ;;  %v5860_v2 = vld [vmem:[#allocation6 + $0x1a8] ss:$16 sps:$4 sm:$0xff]  }
  0x82   :  { %v5861_v3 = vld [vmem:[#allocation6 + $0x1c4] ss:$16 sps:$4 sm:$0xff]   ;;  %v5863_v4 = vld [vmem:[#allocation6 + $0x1cc] ss:$16 sps:$4 sm:$0xff]   ;;  %v5865_v5 = vld [vmem:[#allocation6 + $0x1c0] ss:$16 sps:$4 sm:$0xff]  }
  0x83   :  { %v639_v59 = vcombine.high %v631_v55, %v631_v55  ;;  %v5866_v6 = vld [vmem:[#allocation6 + $0x1c8] ss:$16 sps:$4 sm:$0xff]   ;;  %v5867_v7 = vld [vmem:[#allocation6 + $0x1e4] ss:$16 sps:$4 sm:$0xff]   ;;  %v5869_v8 = vld [vmem:[#allocation6 + $0x1ec] ss:$16 sps:$4 sm:$0xff]   ;;  %v7017_v14 = vrot.slane %v631_v55, %v7009_v50 }
  0x84   :  { %3309 = vmatpush1.bf16.msra.mxu0 %v5811_v23  ;;  %3637 = vmatpush1.bf16.msra.mxu1 %v5812_v24  ;;  %v5871_v9 = vld [vmem:[#allocation6 + $0x1e0] ss:$16 sps:$4 sm:$0xff]   ;;  %v5872_v10 = vld [vmem:[#allocation6 + $0x1e8] ss:$16 sps:$4 sm:$0xff]   ;;  %v5875_v11 = vld [vmem:[#allocation6 + $0x204] ss:$16 sps:$4 sm:$0xff]  }
  0x85   :  { %3310 = vmatprep.subr.bf16.mxu0 %v5813_v25  ;;  %3638 = vmatprep.subr.bf16.mxu1 %v5815_v26  ;;  %v661_v61 = vrot.slane %v639_v59, %v7009_v50  ;;  %v5878_v12 = vld [vmem:[#allocation6 + $0x20c] ss:$16 sps:$4 sm:$0xff]   ;;  %v5873_v13 = vld [vmem:[#allocation6 + $0x200] ss:$16 sps:$4 sm:$0xff]   ;;  %v5876_v15 = vld [vmem:[#allocation6 + $0x208] ss:$16 sps:$4 sm:$0xff]  }
  0x86   :  { %v5881_v16 = vld [vmem:[#allocation6 + $0x224] ss:$16 sps:$4 sm:$0xff]   ;;  %v5884_v17 = vld [vmem:[#allocation6 + $0x22c] ss:$16 sps:$4 sm:$0xff]   ;;  %v5879_v19 = vld [vmem:[#allocation6 + $0x220] ss:$16 sps:$4 sm:$0xff]  }
  0x87   :  { %3330 = vmatprep.mubr.bf16.mxu0 %v661_v61  ;;  %3658 = vmatprep.mubr.bf16.mxu1 %v661_v61  ;;  %v671_v18 = vcombine.high %v661_v61, %v661_v61  ;;  %v5882_v20 = vld [vmem:[#allocation6 + $0x228] ss:$16 sps:$4 sm:$0xff]   ;;  %v5887_v21 = vld [vmem:[#allocation6 + $0x244] ss:$16 sps:$4 sm:$0xff]   ;;  %v5890_v22 = vld [vmem:[#allocation6 + $0x24c] ss:$16 sps:$4 sm:$0xff]  }
  0x88   :  { %3311 = vmatpush1.bf16.msra.mxu0 %v5817_v27  ;;  %3639 = vmatpush1.bf16.msra.mxu1 %v5818_v28  ;;  %v5885_v23 = vld [vmem:[#allocation6 + $0x240] ss:$16 sps:$4 sm:$0xff]   ;;  %v5888_v24 = vld [vmem:[#allocation6 + $0x248] ss:$16 sps:$4 sm:$0xff]   ;;  %v5893_v25 = vld [vmem:[#allocation6 + $0x264] ss:$16 sps:$4 sm:$0xff]  }
  0x89   :  { %3312 = vmatprep.subr.bf16.mxu0 %v5819_v29  ;;  %3640 = vmatprep.subr.bf16.mxu1 %v5821_v30  ;;  %v5896_v26 = vld [vmem:[#allocation6 + $0x26c] ss:$16 sps:$4 sm:$0xff]   ;;  %v5891_v27 = vld [vmem:[#allocation6 + $0x260] ss:$16 sps:$4 sm:$0xff]   ;;  %v5894_v28 = vld [vmem:[#allocation6 + $0x268] ss:$16 sps:$4 sm:$0xff]  }
  0x8a   :  { %v5899_v29 = vld [vmem:[#allocation6 + $0x284] ss:$16 sps:$4 sm:$0xff]   ;;  %v5902_v30 = vld [vmem:[#allocation6 + $0x28c] ss:$16 sps:$4 sm:$0xff]   ;;  %v5909_v39 = vld [vmem:[#allocation6 + $0x2c0] ss:$16 sps:$4 sm:$0xff]  }
  0x8b   :  { %v5911_v37 = vld [vmem:[#allocation6 + $0x2c4] ss:$16 sps:$4 sm:$0xff]   ;;  %v5914_v38 = vld [vmem:[#allocation6 + $0x2cc] ss:$16 sps:$4 sm:$0xff]   ;;  %v5915_v43 = vld [vmem:[#allocation6 + $0x2e0] ss:$16 sps:$4 sm:$0xff]  }
  0x8c   :  { %3313 = vmatpush1.bf16.msra.mxu0 %v5823_v31  ;;  %3641 = vmatpush1.bf16.msra.mxu1 %v5824_v32  ;;  %v5897_v31 = vld [vmem:[#allocation6 + $0x280] ss:$16 sps:$4 sm:$0xff]   ;;  %v5900_v32 = vld [vmem:[#allocation6 + $0x288] ss:$16 sps:$4 sm:$0xff]   ;;  %v5944_v61 = vld [vmem:[#allocation6 + $0x36c] ss:$16 sps:$4 sm:$0xff]  }
  0x8d   :  { %3314 = vmatprep.subr.bf16.mxu0 %v5825_v33  ;;  %3642 = vmatprep.subr.bf16.mxu1 %v5827_v34  ;;  %v5905_v33 = vld [vmem:[#allocation6 + $0x2a4] ss:$16 sps:$4 sm:$0xff]   ;;  %v5908_v34 = vld [vmem:[#allocation6 + $0x2ac] ss:$16 sps:$4 sm:$0xff]   ;;  %v5930_v55 = vld [vmem:[#allocation6 + $0x328] ss:$16 sps:$4 sm:$0xff]  }
  0x8e   :  { %v5936_v59 = vld [vmem:[#allocation6 + $0x348] ss:$16 sps:$4 sm:$0xff]  }
  0x90   :  { %3315 = vmatpush1.bf16.msra.mxu0 %v5829_v35  ;;  %3643 = vmatpush1.bf16.msra.mxu1 %v5830_v36  ;;  %v5903_v35 = vld [vmem:[#allocation6 + $0x2a0] ss:$16 sps:$4 sm:$0xff]   ;;  %v5906_v36 = vld [vmem:[#allocation6 + $0x2a8] ss:$16 sps:$4 sm:$0xff]  }
  0x91   :  { %3316 = vmatprep.subr.bf16.mxu0 %v5831_v40  ;;  %3644 = vmatprep.subr.bf16.mxu1 %v5833_v41  ;;  %v5912_v40 = vld [vmem:[#allocation6 + $0x2c8] ss:$16 sps:$4 sm:$0xff]   ;;  %v5917_v41 = vld [vmem:[#allocation6 + $0x2e4] ss:$16 sps:$4 sm:$0xff]  }
  0x94   :  { %3317 = vmatpush1.bf16.msra.mxu0 %v5835_v42  ;;  %3645 = vmatpush1.bf16.msra.mxu1 %v5836_v45  ;;  %v5920_v42 = vld [vmem:[#allocation6 + $0x2ec] ss:$16 sps:$4 sm:$0xff]   ;;  %v5918_v45 = vld [vmem:[#allocation6 + $0x2e8] ss:$16 sps:$4 sm:$0xff]  }
  0x95   :  { %3318 = vmatprep.subr.bf16.mxu0 %v5837_v46  ;;  %3646 = vmatprep.subr.bf16.mxu1 %v5839_v47  ;;  %v5923_v46 = vld [vmem:[#allocation6 + $0x304] ss:$16 sps:$4 sm:$0xff]   ;;  %v5926_v47 = vld [vmem:[#allocation6 + $0x30c] ss:$16 sps:$4 sm:$0xff]  }
  0x98   :  { %3319 = vmatpush1.bf16.msra.mxu0 %v5841_v48  ;;  %3647 = vmatpush1.bf16.msra.mxu1 %v5842_v49  ;;  %v5921_v48 = vld [vmem:[#allocation6 + $0x300] ss:$16 sps:$4 sm:$0xff]   ;;  %v5924_v49 = vld [vmem:[#allocation6 + $0x308] ss:$16 sps:$4 sm:$0xff]  }
  0x99   :  { %3320 = vmatprep.subr.bf16.mxu0 %v5843_v51  ;;  %3648 = vmatprep.subr.bf16.mxu1 %v5845_v52  ;;  %v5929_v51 = vld [vmem:[#allocation6 + $0x324] ss:$16 sps:$4 sm:$0xff]   ;;  %v5932_v52 = vld [vmem:[#allocation6 + $0x32c] ss:$16 sps:$4 sm:$0xff]  }
  0x9c   :  { %3321 = vmatpush1.bf16.msra.mxu0 %v5847_v54  ;;  %3649 = vmatpush1.bf16.msra.mxu1 %v5848_v56  ;;  %v5927_v54 = vld [vmem:[#allocation6 + $0x320] ss:$16 sps:$4 sm:$0xff]   ;;  %v5935_v56 = vld [vmem:[#allocation6 + $0x344] ss:$16 sps:$4 sm:$0xff]  }
  0x9d   :  { %3322 = vmatprep.subr.bf16.mxu0 %v5849_v57  ;;  %3650 = vmatprep.subr.bf16.mxu1 %v5851_v58  ;;  %v5938_v57 = vld [vmem:[#allocation6 + $0x34c] ss:$16 sps:$4 sm:$0xff]   ;;  %v5933_v58 = vld [vmem:[#allocation6 + $0x340] ss:$16 sps:$4 sm:$0xff]  }
  0xa0   :  { %3323 = vmatpush1.bf16.msra.mxu0 %v5853_v60  ;;  %3651 = vmatpush1.bf16.msra.mxu1 %v5854_v62  ;;  %v5941_v60 = vld [vmem:[#allocation6 + $0x364] ss:$16 sps:$4 sm:$0xff]   ;;  %v5939_v62 = vld [vmem:[#allocation6 + $0x360] ss:$16 sps:$4 sm:$0xff]  }
  0xa1   :  { %3324 = vmatprep.subr.bf16.mxu0 %v5855_v63  ;;  %3652 = vmatprep.subr.bf16.mxu1 %v5857_v0  ;;  %v5942_v63 = vld [vmem:[#allocation6 + $0x368] ss:$16 sps:$4 sm:$0xff]   ;;  %v5947_v0 = vld [vmem:[#allocation6 + $0x384] ss:$16 sps:$4 sm:$0xff]  }
  0xa4   :  { %3325 = vmatpush1.bf16.msra.mxu0 %v5859_v1  ;;  %3653 = vmatpush1.bf16.msra.mxu1 %v5860_v2  ;;  %v5950_v1 = vld [vmem:[#allocation6 + $0x38c] ss:$16 sps:$4 sm:$0xff]   ;;  %v5945_v2 = vld [vmem:[#allocation6 + $0x380] ss:$16 sps:$4 sm:$0xff]  }
  0xa5   :  { %3326 = vmatprep.subr.bf16.mxu0 %v5861_v3  ;;  %3654 = vmatprep.subr.bf16.mxu1 %v5863_v4  ;;  %v5948_v3 = vld [vmem:[#allocation6 + $0x388] ss:$16 sps:$4 sm:$0xff]   ;;  %v5953_v4 = vld [vmem:[#allocation6 + $0x3a4] ss:$16 sps:$4 sm:$0xff]  }
  0xa8   :  { %3327 = vmatpush1.bf16.msra.mxu0 %v5865_v5  ;;  %3655 = vmatpush1.bf16.msra.mxu1 %v5866_v6  ;;  %v5956_v5 = vld [vmem:[#allocation6 + $0x3ac] ss:$16 sps:$4 sm:$0xff]   ;;  %v5951_v6 = vld [vmem:[#allocation6 + $0x3a0] ss:$16 sps:$4 sm:$0xff]  }
  0xa9   :  { %3328 = vmatprep.subr.bf16.mxu0 %v5867_v7  ;;  %3656 = vmatprep.subr.bf16.mxu1 %v5869_v8  ;;  %v5954_v7 = vld [vmem:[#allocation6 + $0x3a8] ss:$16 sps:$4 sm:$0xff]   ;;  %v5959_v8 = vld [vmem:[#allocation6 + $0x3c4] ss:$16 sps:$4 sm:$0xff]  }
  0xac   :  { %3329 = vmatpush1.bf16.msra.mxu0 %v5871_v9  ;;  %3657 = vmatpush1.bf16.msra.mxu1 %v5872_v10  ;;  %v5962_v9 = vld [vmem:[#allocation6 + $0x3cc] ss:$16 sps:$4 sm:$0xff]   ;;  %v624_v10 = vcombine.high %v7011_v53, %v7011_v53 }
  0xad   :  { %3339 = vmatprep.subr.bf16.mxu0 %v5875_v11  ;;  %3667 = vmatprep.subr.bf16.mxu1 %v5878_v12  ;;  %v5957_v11 = vld [vmem:[#allocation6 + $0x3c0] ss:$16 sps:$4 sm:$0xff]   ;;  %v5960_v12 = vld [vmem:[#allocation6 + $0x3c8] ss:$16 sps:$4 sm:$0xff]  }
  0xaf   :  { %3331 = vmatmul.mubr.bf16.vlgmr.msra.gmra.mrb[0].mxu0 %v7017_v14  ;;  %3659 = vmatmul.mubr.bf16.vlgmr.msra.gmra.mrb[0].mxu1 %v7017_v14 }
  0xb0   :  { %3340 = vmatpush1.bf16.msra.mxu0 %v5873_v13  ;;  %3668 = vmatpush1.bf16.msra.mxu1 %v5876_v15  ;;  %v5965_v13 = vld [vmem:[#allocation6 + $0x3e4] ss:$16 sps:$4 sm:$0xff]   ;;  %v5968_v15 = vld [vmem:[#allocation6 + $0x3ec] ss:$16 sps:$4 sm:$0xff]  }
  0xb1   :  { %3341 = vmatprep.subr.bf16.mxu0 %v5881_v16  ;;  %3669 = vmatprep.subr.bf16.mxu1 %v5884_v17  ;;  %v7024_v16 = vrot.slane %v624_v10, %v7009_v50  ;;  %v5963_v17 = vld [vmem:[#allocation6 + $0x3e0] ss:$16 sps:$4 sm:$0xff]   ;;  %v6044_v10 = vld [vmem:[#allocation6 + $0x588] ss:$16 sps:$4 sm:$0xff]  }
  0xb2   :  { %3371 = vmatprep.mubr.bf16.mxu0 %v671_v18  ;;  %3699 = vmatprep.mubr.bf16.mxu1 %v671_v18  ;;  %v5966_v18 = vld [vmem:[#allocation6 + $0x3e8] ss:$16 sps:$4 sm:$0xff]  }
  0xb3   :  { %v640_v53 = vcombine.high %v7024_v16, %v7024_v16 }
  0xb4   :  { %3342 = vmatpush1.bf16.msra.mxu0 %v5879_v19  ;;  %3670 = vmatpush1.bf16.msra.mxu1 %v5882_v20  ;;  %v5971_v19 = vld [vmem:[#allocation6 + $0x404] ss:$16 sps:$4 sm:$0xff]   ;;  %v5974_v20 = vld [vmem:[#allocation6 + $0x40c] ss:$16 sps:$4 sm:$0xff]  }
  0xb5   :  { %3343 = vmatprep.subr.bf16.mxu0 %v5887_v21  ;;  %3671 = vmatprep.subr.bf16.mxu1 %v5890_v22  ;;  %v5969_v21 = vld [vmem:[#allocation6 + $0x400] ss:$16 sps:$4 sm:$0xff]   ;;  %v669_v22 = vcombine.high %v7017_v14, %v7017_v14  ;;  %v5986_v14 = vld [vmem:[#allocation6 + $0x44c] ss:$16 sps:$4 sm:$0xff]  }
  0xb8   :  { %3344 = vmatpush1.bf16.msra.mxu0 %v5885_v23  ;;  %3672 = vmatpush1.bf16.msra.mxu1 %v5888_v24  ;;  %v5972_v23 = vld [vmem:[#allocation6 + $0x408] ss:$16 sps:$4 sm:$0xff]   ;;  %v5977_v24 = vld [vmem:[#allocation6 + $0x424] ss:$16 sps:$4 sm:$0xff]  }
  0xb9   :  { %3345 = vmatprep.subr.bf16.mxu0 %v5893_v25  ;;  %3673 = vmatprep.subr.bf16.mxu1 %v5896_v26  ;;  %v5980_v25 = vld [vmem:[#allocation6 + $0x42c] ss:$16 sps:$4 sm:$0xff]   ;;  %v7031_v26 = vrot.slane %v640_v53, %v7009_v50  ;;  %v6061_v53 = vld [vmem:[#allocation6 + $0x5e4] ss:$16 sps:$4 sm:$0xff]  }
  0xbc   :  { %3346 = vmatpush1.bf16.msra.mxu0 %v5891_v27  ;;  %3674 = vmatpush1.bf16.msra.mxu1 %v5894_v28  ;;  %v5975_v27 = vld [vmem:[#allocation6 + $0x420] ss:$16 sps:$4 sm:$0xff]   ;;  %v5978_v28 = vld [vmem:[#allocation6 + $0x428] ss:$16 sps:$4 sm:$0xff]  }
  0xbd   :  { %3347 = vmatprep.subr.bf16.mxu0 %v5899_v29  ;;  %3675 = vmatprep.subr.bf16.mxu1 %v5902_v30  ;;  %v5983_v29 = vld [vmem:[#allocation6 + $0x444] ss:$16 sps:$4 sm:$0xff]   ;;  %v5981_v30 = vld [vmem:[#allocation6 + $0x440] ss:$16 sps:$4 sm:$0xff]  }
  0xc0   :  { %3348 = vmatpush1.bf16.msra.mxu0 %v5897_v31  ;;  %3676 = vmatpush1.bf16.msra.mxu1 %v5900_v32  ;;  %v5984_v31 = vld [vmem:[#allocation6 + $0x448] ss:$16 sps:$4 sm:$0xff]   ;;  %v5989_v32 = vld [vmem:[#allocation6 + $0x464] ss:$16 sps:$4 sm:$0xff]  }
  0xc1   :  { %3349 = vmatprep.subr.bf16.mxu0 %v5905_v33  ;;  %3677 = vmatprep.subr.bf16.mxu1 %v5908_v34  ;;  %v5992_v33 = vld [vmem:[#allocation6 + $0x46c] ss:$16 sps:$4 sm:$0xff]   ;;  %v5987_v34 = vld [vmem:[#allocation6 + $0x460] ss:$16 sps:$4 sm:$0xff]  }
  0xc4   :  { %3350 = vmatpush1.bf16.msra.mxu0 %v5903_v35  ;;  %3678 = vmatpush1.bf16.msra.mxu1 %v5906_v36  ;;  %v5990_v35 = vld [vmem:[#allocation6 + $0x468] ss:$16 sps:$4 sm:$0xff]   ;;  %v5995_v36 = vld [vmem:[#allocation6 + $0x484] ss:$16 sps:$4 sm:$0xff]  }
  0xc5   :  { %3351 = vmatprep.subr.bf16.mxu0 %v5911_v37  ;;  %3679 = vmatprep.subr.bf16.mxu1 %v5914_v38  ;;  %v5998_v37 = vld [vmem:[#allocation6 + $0x48c] ss:$16 sps:$4 sm:$0xff]   ;;  %v5993_v38 = vld [vmem:[#allocation6 + $0x480] ss:$16 sps:$4 sm:$0xff]  }
  0xc8   :  { %3352 = vmatpush1.bf16.msra.mxu0 %v5909_v39  ;;  %3680 = vmatpush1.bf16.msra.mxu1 %v5912_v40  ;;  %v5996_v39 = vld [vmem:[#allocation6 + $0x488] ss:$16 sps:$4 sm:$0xff]   ;;  %v6001_v40 = vld [vmem:[#allocation6 + $0x4a4] ss:$16 sps:$4 sm:$0xff]  }
  0xc9   :  { %3353 = vmatprep.subr.bf16.mxu0 %v5917_v41  ;;  %3681 = vmatprep.subr.bf16.mxu1 %v5920_v42  ;;  %v6004_v41 = vld [vmem:[#allocation6 + $0x4ac] ss:$16 sps:$4 sm:$0xff]   ;;  %v5999_v42 = vld [vmem:[#allocation6 + $0x4a0] ss:$16 sps:$4 sm:$0xff]  }
  0xcc   :  { %3354 = vmatpush1.bf16.msra.mxu0 %v5915_v43  ;;  %3682 = vmatpush1.bf16.msra.mxu1 %v5918_v45  ;;  %v6002_v43 = vld [vmem:[#allocation6 + $0x4a8] ss:$16 sps:$4 sm:$0xff]   ;;  %v6007_v45 = vld [vmem:[#allocation6 + $0x4c4] ss:$16 sps:$4 sm:$0xff]  }
  0xcd   :  { %3355 = vmatprep.subr.bf16.mxu0 %v5923_v46  ;;  %3683 = vmatprep.subr.bf16.mxu1 %v5926_v47  ;;  %v6010_v46 = vld [vmem:[#allocation6 + $0x4cc] ss:$16 sps:$4 sm:$0xff]   ;;  %v6005_v47 = vld [vmem:[#allocation6 + $0x4c0] ss:$16 sps:$4 sm:$0xff]  }
  0xd0   :  { %3356 = vmatpush1.bf16.msra.mxu0 %v5921_v48  ;;  %3684 = vmatpush1.bf16.msra.mxu1 %v5924_v49  ;;  %v6008_v48 = vld [vmem:[#allocation6 + $0x4c8] ss:$16 sps:$4 sm:$0xff]   ;;  %v6013_v49 = vld [vmem:[#allocation6 + $0x4e4] ss:$16 sps:$4 sm:$0xff]  }
  0xd1   :  { %3357 = vmatprep.subr.bf16.mxu0 %v5929_v51  ;;  %3685 = vmatprep.subr.bf16.mxu1 %v5932_v52  ;;  %v6016_v51 = vld [vmem:[#allocation6 + $0x4ec] ss:$16 sps:$4 sm:$0xff]   ;;  %v6011_v52 = vld [vmem:[#allocation6 + $0x4e0] ss:$16 sps:$4 sm:$0xff]  }
  0xd4   :  { %3358 = vmatpush1.bf16.msra.mxu0 %v5927_v54  ;;  %3686 = vmatpush1.bf16.msra.mxu1 %v5930_v55  ;;  %v6014_v54 = vld [vmem:[#allocation6 + $0x4e8] ss:$16 sps:$4 sm:$0xff]   ;;  %v6019_v55 = vld [vmem:[#allocation6 + $0x504] ss:$16 sps:$4 sm:$0xff]  }
  0xd5   :  { %3359 = vmatprep.subr.bf16.mxu0 %v5935_v56  ;;  %3687 = vmatprep.subr.bf16.mxu1 %v5938_v57  ;;  %v6022_v56 = vld [vmem:[#allocation6 + $0x50c] ss:$16 sps:$4 sm:$0xff]   ;;  %v6017_v57 = vld [vmem:[#allocation6 + $0x500] ss:$16 sps:$4 sm:$0xff]  }
  0xd8   :  { %3360 = vmatpush1.bf16.msra.mxu0 %v5933_v58  ;;  %3688 = vmatpush1.bf16.msra.mxu1 %v5936_v59  ;;  %v6020_v58 = vld [vmem:[#allocation6 + $0x508] ss:$16 sps:$4 sm:$0xff]   ;;  %v6025_v59 = vld [vmem:[#allocation6 + $0x524] ss:$16 sps:$4 sm:$0xff]  }
  0xd9   :  { %3361 = vmatprep.subr.bf16.mxu0 %v5941_v60  ;;  %3689 = vmatprep.subr.bf16.mxu1 %v5944_v61  ;;  %v6028_v60 = vld [vmem:[#allocation6 + $0x52c] ss:$16 sps:$4 sm:$0xff]   ;;  %v6023_v61 = vld [vmem:[#allocation6 + $0x520] ss:$16 sps:$4 sm:$0xff]  }
  0xdc   :  { %3362 = vmatpush1.bf16.msra.mxu0 %v5939_v62  ;;  %3690 = vmatpush1.bf16.msra.mxu1 %v5942_v63  ;;  %v6026_v62 = vld [vmem:[#allocation6 + $0x528] ss:$16 sps:$4 sm:$0xff]   ;;  %v6031_v63 = vld [vmem:[#allocation6 + $0x544] ss:$16 sps:$4 sm:$0xff]  }
  0xdd   :  { %3363 = vmatprep.subr.bf16.mxu0 %v5947_v0  ;;  %3691 = vmatprep.subr.bf16.mxu1 %v5950_v1  ;;  %v6034_v0 = vld [vmem:[#allocation6 + $0x54c] ss:$16 sps:$4 sm:$0xff]   ;;  %v6029_v1 = vld [vmem:[#allocation6 + $0x540] ss:$16 sps:$4 sm:$0xff]  }
  0xe0   :  { %3364 = vmatpush1.bf16.msra.mxu0 %v5945_v2  ;;  %3692 = vmatpush1.bf16.msra.mxu1 %v5948_v3  ;;  %v6032_v2 = vld [vmem:[#allocation6 + $0x548] ss:$16 sps:$4 sm:$0xff]   ;;  %v6037_v3 = vld [vmem:[#allocation6 + $0x564] ss:$16 sps:$4 sm:$0xff]  }
  0xe1   :  { %3365 = vmatprep.subr.bf16.mxu0 %v5953_v4  ;;  %3693 = vmatprep.subr.bf16.mxu1 %v5956_v5  ;;  %v6040_v4 = vld [vmem:[#allocation6 + $0x56c] ss:$16 sps:$4 sm:$0xff]   ;;  %v6035_v5 = vld [vmem:[#allocation6 + $0x560] ss:$16 sps:$4 sm:$0xff]  }
  0xe4   :  { %3366 = vmatpush1.bf16.msra.mxu0 %v5951_v6  ;;  %3694 = vmatpush1.bf16.msra.mxu1 %v5954_v7  ;;  %v6038_v6 = vld [vmem:[#allocation6 + $0x568] ss:$16 sps:$4 sm:$0xff]   ;;  %v6043_v7 = vld [vmem:[#allocation6 + $0x584] ss:$16 sps:$4 sm:$0xff]  }
  0xe5   :  { %3367 = vmatprep.subr.bf16.mxu0 %v5959_v8  ;;  %3695 = vmatprep.subr.bf16.mxu1 %v5962_v9  ;;  %v6046_v8 = vld [vmem:[#allocation6 + $0x58c] ss:$16 sps:$4 sm:$0xff]   ;;  %v6041_v9 = vld [vmem:[#allocation6 + $0x580] ss:$16 sps:$4 sm:$0xff]  }
  0xe8   :  { %3368 = vmatpush1.bf16.msra.mxu0 %v5957_v11  ;;  %3696 = vmatpush1.bf16.msra.mxu1 %v5960_v12  ;;  %v6049_v11 = vld [vmem:[#allocation6 + $0x5a4] ss:$16 sps:$4 sm:$0xff]   ;;  %v6052_v12 = vld [vmem:[#allocation6 + $0x5ac] ss:$16 sps:$4 sm:$0xff]  }
  0xe9   :  { %3369 = vmatprep.subr.bf16.mxu0 %v5965_v13  ;;  %3697 = vmatprep.subr.bf16.mxu1 %v5968_v15  ;;  %v6047_v13 = vld [vmem:[#allocation6 + $0x5a0] ss:$16 sps:$4 sm:$0xff]   ;;  %v6050_v15 = vld [vmem:[#allocation6 + $0x5a8] ss:$16 sps:$4 sm:$0xff]  }
  0xec   :  { %3370 = vmatpush1.bf16.msra.mxu0 %v5963_v17  ;;  %3698 = vmatpush1.bf16.msra.mxu1 %v5966_v18  ;;  %v6055_v17 = vld [vmem:[#allocation6 + $0x5c4] ss:$16 sps:$4 sm:$0xff]   ;;  %v6058_v18 = vld [vmem:[#allocation6 + $0x5cc] ss:$16 sps:$4 sm:$0xff]  }
  0xed   :  { %3380 = vmatprep.subr.bf16.mxu0 %v5971_v19  ;;  %3708 = vmatprep.subr.bf16.mxu1 %v5974_v20  ;;  %v6053_v19 = vld [vmem:[#allocation6 + $0x5c0] ss:$16 sps:$4 sm:$0xff]   ;;  %v6056_v20 = vld [vmem:[#allocation6 + $0x5c8] ss:$16 sps:$4 sm:$0xff]  }
  0xef   :  { %3372 = vmatmul.mubr.bf16.vlgmr.msra.gmra.mrb[0].mxu0 %v669_v22  ;;  %3700 = vmatmul.mubr.bf16.vlgmr.msra.gmra.mrb[0].mxu1 %v669_v22  ;;  %v6059_v22 = vld [vmem:[#allocation6 + $0x5e0] ss:$16 sps:$4 sm:$0xff]  }
  0xf0   :  { %3381 = vmatpush1.bf16.msra.mxu0 %v5969_v21  ;;  %3709 = vmatpush1.bf16.msra.mxu1 %v5972_v23  ;;  %v6064_v21 = vld [vmem:[#allocation6 + $0x5ec] ss:$16 sps:$4 sm:$0xff]   ;;  %v6062_v23 = vld [vmem:[#allocation6 + $0x5e8] ss:$16 sps:$4 sm:$0xff]  }
  0xf1   :  { %3382 = vmatprep.subr.bf16.mxu0 %v5977_v24  ;;  %3710 = vmatprep.subr.bf16.mxu1 %v5980_v25  ;;  %v6068_v24 = vld [vmem:[#allocation6 + $0x604] ss:$16 sps:$4 sm:$0xff]   ;;  %v6071_v25 = vld [vmem:[#allocation6 + $0x60c] ss:$16 sps:$4 sm:$0xff]  }
  0xf2   :  { %3412 = vmatprep.mubr.bf16.mxu0 %v7031_v26  ;;  %3740 = vmatprep.mubr.bf16.mxu1 %v7031_v26 }
  0xf4   :  { %3383 = vmatpush1.bf16.msra.mxu0 %v5975_v27  ;;  %3711 = vmatpush1.bf16.msra.mxu1 %v5978_v28  ;;  %v6066_v27 = vld [vmem:[#allocation6 + $0x600] ss:$16 sps:$4 sm:$0xff]   ;;  %v7037_v28 = vrot.slane %v7024_v16, %v7009_v50  ;;  %v6080_v16 = vld [vmem:[#allocation6 + $0x644] ss:$16 sps:$4 sm:$0xff]  }
  0xf5   :  { %3384 = vmatprep.subr.bf16.mxu0 %v5983_v29  ;;  %3712 = vmatprep.subr.bf16.mxu1 %v5986_v14  ;;  %v6069_v29 = vld [vmem:[#allocation6 + $0x608] ss:$16 sps:$4 sm:$0xff]   ;;  %v6074_v14 = vld [vmem:[#allocation6 + $0x624] ss:$16 sps:$4 sm:$0xff]  }
  0xf8   :  { %3385 = vmatpush1.bf16.msra.mxu0 %v5981_v30  ;;  %3713 = vmatpush1.bf16.msra.mxu1 %v5984_v31  ;;  %v6077_v30 = vld [vmem:[#allocation6 + $0x62c] ss:$16 sps:$4 sm:$0xff]   ;;  %v672_v31 = vcombine.high %v7031_v26, %v7031_v26  ;;  %v6086_v26 = vld [vmem:[#allocation6 + $0x664] ss:$16 sps:$4 sm:$0xff]  }
  0xf9   :  { %3386 = vmatprep.subr.bf16.mxu0 %v5989_v32  ;;  %3714 = vmatprep.subr.bf16.mxu1 %v5992_v33  ;;  %v6072_v32 = vld [vmem:[#allocation6 + $0x620] ss:$16 sps:$4 sm:$0xff]   ;;  %v6075_v33 = vld [vmem:[#allocation6 + $0x628] ss:$16 sps:$4 sm:$0xff]  }
  0xfc   :  { %3387 = vmatpush1.bf16.msra.mxu0 %v5987_v34  ;;  %3715 = vmatpush1.bf16.msra.mxu1 %v5990_v35  ;;  %v6083_v34 = vld [vmem:[#allocation6 + $0x64c] ss:$16 sps:$4 sm:$0xff]   ;;  %v6078_v35 = vld [vmem:[#allocation6 + $0x640] ss:$16 sps:$4 sm:$0xff]  }
  0xfd   :  { %3388 = vmatprep.subr.bf16.mxu0 %v5995_v36  ;;  %3716 = vmatprep.subr.bf16.mxu1 %v5998_v37  ;;  %v6081_v36 = vld [vmem:[#allocation6 + $0x648] ss:$16 sps:$4 sm:$0xff]   ;;  %v6089_v37 = vld [vmem:[#allocation6 + $0x66c] ss:$16 sps:$4 sm:$0xff]  }
 0x100   :  { %3389 = vmatpush1.bf16.msra.mxu0 %v5993_v38  ;;  %3717 = vmatpush1.bf16.msra.mxu1 %v5996_v39  ;;  %v6084_v38 = vld [vmem:[#allocation6 + $0x660] ss:$16 sps:$4 sm:$0xff]   ;;  %v6087_v39 = vld [vmem:[#allocation6 + $0x668] ss:$16 sps:$4 sm:$0xff]  }
 0x101   :  { %3390 = vmatprep.subr.bf16.mxu0 %v6001_v40  ;;  %3718 = vmatprep.subr.bf16.mxu1 %v6004_v41  ;;  %v6092_v40 = vld [vmem:[#allocation6 + $0x684] ss:$16 sps:$4 sm:$0xff]   ;;  %v6095_v41 = vld [vmem:[#allocation6 + $0x68c] ss:$16 sps:$4 sm:$0xff]  }
 0x104   :  { %3391 = vmatpush1.bf16.msra.mxu0 %v5999_v42  ;;  %3719 = vmatpush1.bf16.msra.mxu1 %v6002_v43  ;;  %v6090_v42 = vld [vmem:[#allocation6 + $0x680] ss:$16 sps:$4 sm:$0xff]   ;;  %v6093_v43 = vld [vmem:[#allocation6 + $0x688] ss:$16 sps:$4 sm:$0xff]  }
 0x105   :  { %3392 = vmatprep.subr.bf16.mxu0 %v6007_v45  ;;  %3720 = vmatprep.subr.bf16.mxu1 %v6010_v46  ;;  %v6098_v45 = vld [vmem:[#allocation6 + $0x6a4] ss:$16 sps:$4 sm:$0xff]   ;;  %v6101_v46 = vld [vmem:[#allocation6 + $0x6ac] ss:$16 sps:$4 sm:$0xff]  }
 0x108   :  { %3393 = vmatpush1.bf16.msra.mxu0 %v6005_v47  ;;  %3721 = vmatpush1.bf16.msra.mxu1 %v6008_v48  ;;  %v6096_v47 = vld [vmem:[#allocation6 + $0x6a0] ss:$16 sps:$4 sm:$0xff]   ;;  %v6099_v48 = vld [vmem:[#allocation6 + $0x6a8] ss:$16 sps:$4 sm:$0xff]  }
 0x109   :  { %3394 = vmatprep.subr.bf16.mxu0 %v6013_v49  ;;  %3722 = vmatprep.subr.bf16.mxu1 %v6016_v51  ;;  %v6104_v49 = vld [vmem:[#allocation6 + $0x6c4] ss:$16 sps:$4 sm:$0xff]   ;;  %v6107_v51 = vld [vmem:[#allocation6 + $0x6cc] ss:$16 sps:$4 sm:$0xff]  }
 0x10c   :  { %3395 = vmatpush1.bf16.msra.mxu0 %v6011_v52  ;;  %3723 = vmatpush1.bf16.msra.mxu1 %v6014_v54  ;;  %v6102_v52 = vld [vmem:[#allocation6 + $0x6c0] ss:$16 sps:$4 sm:$0xff]   ;;  %v6105_v54 = vld [vmem:[#allocation6 + $0x6c8] ss:$16 sps:$4 sm:$0xff]  }
 0x10d   :  { %3396 = vmatprep.subr.bf16.mxu0 %v6019_v55  ;;  %3724 = vmatprep.subr.bf16.mxu1 %v6022_v56  ;;  %v6110_v55 = vld [vmem:[#allocation6 + $0x6e4] ss:$16 sps:$4 sm:$0xff]   ;;  %v6113_v56 = vld [vmem:[#allocation6 + $0x6ec] ss:$16 sps:$4 sm:$0xff]  }
 0x110   :  { %3397 = vmatpush1.bf16.msra.mxu0 %v6017_v57  ;;  %3725 = vmatpush1.bf16.msra.mxu1 %v6020_v58  ;;  %v6108_v57 = vld [vmem:[#allocation6 + $0x6e0] ss:$16 sps:$4 sm:$0xff]   ;;  %v6111_v58 = vld [vmem:[#allocation6 + $0x6e8] ss:$16 sps:$4 sm:$0xff]  }
 0x111   :  { %3398 = vmatprep.subr.bf16.mxu0 %v6025_v59  ;;  %3726 = vmatprep.subr.bf16.mxu1 %v6028_v60  ;;  %v6116_v59 = vld [vmem:[#allocation6 + $0x704] ss:$16 sps:$4 sm:$0xff]   ;;  %v6119_v60 = vld [vmem:[#allocation6 + $0x70c] ss:$16 sps:$4 sm:$0xff]  }
 0x114   :  { %3399 = vmatpush1.bf16.msra.mxu0 %v6023_v61  ;;  %3727 = vmatpush1.bf16.msra.mxu1 %v6026_v62  ;;  %v6114_v61 = vld [vmem:[#allocation6 + $0x700] ss:$16 sps:$4 sm:$0xff]   ;;  %v6117_v62 = vld [vmem:[#allocation6 + $0x708] ss:$16 sps:$4 sm:$0xff]  }
 0x115   :  { %3400 = vmatprep.subr.bf16.mxu0 %v6031_v63  ;;  %3728 = vmatprep.subr.bf16.mxu1 %v6034_v0  ;;  %v6122_v63 = vld [vmem:[#allocation6 + $0x724] ss:$16 sps:$4 sm:$0xff]   ;;  %v6125_v0 = vld [vmem:[#allocation6 + $0x72c] ss:$16 sps:$4 sm:$0xff]  }
 0x118   :  { %3401 = vmatpush1.bf16.msra.mxu0 %v6029_v1  ;;  %3729 = vmatpush1.bf16.msra.mxu1 %v6032_v2  ;;  %v6120_v1 = vld [vmem:[#allocation6 + $0x720] ss:$16 sps:$4 sm:$0xff]   ;;  %v6123_v2 = vld [vmem:[#allocation6 + $0x728] ss:$16 sps:$4 sm:$0xff]  }
 0x119   :  { %3402 = vmatprep.subr.bf16.mxu0 %v6037_v3  ;;  %3730 = vmatprep.subr.bf16.mxu1 %v6040_v4  ;;  %v6128_v3 = vld [vmem:[#allocation6 + $0x744] ss:$16 sps:$4 sm:$0xff]   ;;  %v6131_v4 = vld [vmem:[#allocation6 + $0x74c] ss:$16 sps:$4 sm:$0xff]  }
 0x11c   :  { %3403 = vmatpush1.bf16.msra.mxu0 %v6035_v5  ;;  %3731 = vmatpush1.bf16.msra.mxu1 %v6038_v6  ;;  %v6126_v5 = vld [vmem:[#allocation6 + $0x740] ss:$16 sps:$4 sm:$0xff]   ;;  %v6129_v6 = vld [vmem:[#allocation6 + $0x748] ss:$16 sps:$4 sm:$0xff]  }
 0x11d   :  { %3404 = vmatprep.subr.bf16.mxu0 %v6043_v7  ;;  %3732 = vmatprep.subr.bf16.mxu1 %v6046_v8  ;;  %v6134_v7 = vld [vmem:[#allocation6 + $0x764] ss:$16 sps:$4 sm:$0xff]   ;;  %v6137_v8 = vld [vmem:[#allocation6 + $0x76c] ss:$16 sps:$4 sm:$0xff]  }
 0x120   :  { %3405 = vmatpush1.bf16.msra.mxu0 %v6041_v9  ;;  %3733 = vmatpush1.bf16.msra.mxu1 %v6044_v10  ;;  %v6132_v9 = vld [vmem:[#allocation6 + $0x760] ss:$16 sps:$4 sm:$0xff]   ;;  %v6135_v10 = vld [vmem:[#allocation6 + $0x768] ss:$16 sps:$4 sm:$0xff]  }
 0x121   :  { %3406 = vmatprep.subr.bf16.mxu0 %v6049_v11  ;;  %3734 = vmatprep.subr.bf16.mxu1 %v6052_v12  ;;  %v6140_v11 = vld [vmem:[#allocation6 + $0x784] ss:$16 sps:$4 sm:$0xff]   ;;  %v6143_v12 = vld [vmem:[#allocation6 + $0x78c] ss:$16 sps:$4 sm:$0xff]  }
 0x124   :  { %3407 = vmatpush1.bf16.msra.mxu0 %v6047_v13  ;;  %3735 = vmatpush1.bf16.msra.mxu1 %v6050_v15  ;;  %v6138_v13 = vld [vmem:[#allocation6 + $0x780] ss:$16 sps:$4 sm:$0xff]   ;;  %v6141_v15 = vld [vmem:[#allocation6 + $0x788] ss:$16 sps:$4 sm:$0xff]  }
 0x125   :  { %3408 = vmatprep.subr.bf16.mxu0 %v6055_v17  ;;  %3736 = vmatprep.subr.bf16.mxu1 %v6058_v18  ;;  %v6146_v17 = vld [vmem:[#allocation6 + $0x7a4] ss:$16 sps:$4 sm:$0xff]   ;;  %v6149_v18 = vld [vmem:[#allocation6 + $0x7ac] ss:$16 sps:$4 sm:$0xff]  }
 0x128   :  { %3409 = vmatpush1.bf16.msra.mxu0 %v6053_v19  ;;  %3737 = vmatpush1.bf16.msra.mxu1 %v6056_v20  ;;  %v6144_v19 = vld [vmem:[#allocation6 + $0x7a0] ss:$16 sps:$4 sm:$0xff]   ;;  %v6147_v20 = vld [vmem:[#allocation6 + $0x7a8] ss:$16 sps:$4 sm:$0xff]  }
 0x129   :  { %3410 = vmatprep.subr.bf16.mxu0 %v6061_v53  ;;  %3738 = vmatprep.subr.bf16.mxu1 %v6064_v21  ;;  %v6152_v53 = vld [vmem:[#allocation6 + $0x7c4] ss:$16 sps:$4 sm:$0xff]   ;;  %v6155_v21 = vld [vmem:[#allocation6 + $0x7cc] ss:$16 sps:$4 sm:$0xff]  }
 0x12c   :  { %3411 = vmatpush1.bf16.msra.mxu0 %v6059_v22  ;;  %3739 = vmatpush1.bf16.msra.mxu1 %v6062_v23  ;;  %v7043_v22 = vld.sshfl [vmem:[#allocation4 + $0x8] sm:$0xff pattern:$0x75316420]  ;;  %v6150_v23 = vld [vmem:[#allocation6 + $0x7c0] ss:$16 sps:$4 sm:$0xff]  }
 0x12d   :  { %3421 = vmatprep.subr.bf16.mxu0 %v6068_v24  ;;  %3749 = vmatprep.subr.bf16.mxu1 %v6071_v25  ;;  %v6153_v24 = vld [vmem:[#allocation6 + $0x7c8] ss:$16 sps:$4 sm:$0xff]   ;;  %v6158_v25 = vld [vmem:[#allocation6 + $0x7e4] ss:$16 sps:$4 sm:$0xff]  }
 0x12f   :  { %3413 = vmatmul.mubr.bf16.vlgmr.msra.gmra.mrb[0].mxu0 %v7037_v28  ;;  %3741 = vmatmul.mubr.bf16.vlgmr.msra.gmra.mrb[0].mxu1 %v7037_v28 }
 0x130   :  { %3422 = vmatpush1.bf16.msra.mxu0 %v6066_v27  ;;  %3750 = vmatpush1.bf16.msra.mxu1 %v6069_v29  ;;  %v6161_v27 = vld [vmem:[#allocation6 + $0x7ec] ss:$16 sps:$4 sm:$0xff]   ;;  %v6156_v29 = vld [vmem:[#allocation6 + $0x7e0] ss:$16 sps:$4 sm:$0xff]  }
 0x131   :  { %3423 = vmatprep.subr.bf16.mxu0 %v6074_v14  ;;  %3751 = vmatprep.subr.bf16.mxu1 %v6077_v30  ;;  %v6159_v14 = vld [vmem:[#allocation6 + $0x7e8] ss:$16 sps:$4 sm:$0xff]   ;;  %v6164_v30 = vld [vmem:[#allocation6 + $0x804] ss:$16 sps:$4 sm:$0xff]  }
 0x132   :  { %3453 = vmatprep.mubr.bf16.mxu0 %v672_v31  ;;  %3781 = vmatprep.mubr.bf16.mxu1 %v672_v31  ;;  %v6167_v31 = vld [vmem:[#allocation6 + $0x80c] ss:$16 sps:$4 sm:$0xff]  }
 0x134   :  { %3424 = vmatpush1.bf16.msra.mxu0 %v6072_v32  ;;  %3752 = vmatpush1.bf16.msra.mxu1 %v6075_v33  ;;  %v688_v32 = vcombine.high %v7043_v22, %v7043_v22  ;;  %v670_v33 = vcombine.high %v7037_v28, %v7037_v28  ;;  %v6176_v28 = vld [vmem:[#allocation6 + $0x844] ss:$16 sps:$4 sm:$0xff]  }
 0x135   :  { %3425 = vmatprep.subr.bf16.mxu0 %v6080_v16  ;;  %3753 = vmatprep.subr.bf16.mxu1 %v6083_v34  ;;  %v6162_v16 = vld [vmem:[#allocation6 + $0x800] ss:$16 sps:$4 sm:$0xff]   ;;  %v6165_v34 = vld [vmem:[#allocation6 + $0x808] ss:$16 sps:$4 sm:$0xff]  }
 0x138   :  { %3426 = vmatpush1.bf16.msra.mxu0 %v6078_v35  ;;  %3754 = vmatpush1.bf16.msra.mxu1 %v6081_v36  ;;  %v6170_v35 = vld [vmem:[#allocation6 + $0x824] ss:$16 sps:$4 sm:$0xff]   ;;  %v6173_v36 = vld [vmem:[#allocation6 + $0x82c] ss:$16 sps:$4 sm:$0xff]  }
 0x139   :  { %3427 = vmatprep.subr.bf16.mxu0 %v6086_v26  ;;  %3755 = vmatprep.subr.bf16.mxu1 %v6089_v37  ;;  %v7050_v26 = vrot.slane %v688_v32, %v7009_v50  ;;  %v6168_v37 = vld [vmem:[#allocation6 + $0x820] ss:$16 sps:$4 sm:$0xff]   ;;  %v6254_v32 = vld [vmem:[#allocation6 + $0x9e4] ss:$16 sps:$4 sm:$0xff]  }
 0x13c   :  { %3428 = vmatpush1.bf16.msra.mxu0 %v6084_v38  ;;  %3756 = vmatpush1.bf16.msra.mxu1 %v6087_v39  ;;  %v6171_v38 = vld [vmem:[#allocation6 + $0x828] ss:$16 sps:$4 sm:$0xff]   ;;  %v6179_v39 = vld [vmem:[#allocation6 + $0x84c] ss:$16 sps:$4 sm:$0xff]  }
 0x13d   :  { %3429 = vmatprep.subr.bf16.mxu0 %v6092_v40  ;;  %3757 = vmatprep.subr.bf16.mxu1 %v6095_v41  ;;  %v6174_v40 = vld [vmem:[#allocation6 + $0x840] ss:$16 sps:$4 sm:$0xff]   ;;  %v6177_v41 = vld [vmem:[#allocation6 + $0x848] ss:$16 sps:$4 sm:$0xff]  }
 0x140   :  { %3430 = vmatpush1.bf16.msra.mxu0 %v6090_v42  ;;  %3758 = vmatpush1.bf16.msra.mxu1 %v6093_v43  ;;  %v6182_v42 = vld [vmem:[#allocation6 + $0x864] ss:$16 sps:$4 sm:$0xff]   ;;  %v6185_v43 = vld [vmem:[#allocation6 + $0x86c] ss:$16 sps:$4 sm:$0xff]  }
 0x141   :  { %3431 = vmatprep.subr.bf16.mxu0 %v6098_v45  ;;  %3759 = vmatprep.subr.bf16.mxu1 %v6101_v46  ;;  %v6180_v45 = vld [vmem:[#allocation6 + $0x860] ss:$16 sps:$4 sm:$0xff]   ;;  %v6183_v46 = vld [vmem:[#allocation6 + $0x868] ss:$16 sps:$4 sm:$0xff]  }
 0x144   :  { %3432 = vmatpush1.bf16.msra.mxu0 %v6096_v47  ;;  %3760 = vmatpush1.bf16.msra.mxu1 %v6099_v48  ;;  %v6188_v47 = vld [vmem:[#allocation6 + $0x884] ss:$16 sps:$4 sm:$0xff]   ;;  %v6191_v48 = vld [vmem:[#allocation6 + $0x88c] ss:$16 sps:$4 sm:$0xff]  }
 0x145   :  { %3433 = vmatprep.subr.bf16.mxu0 %v6104_v49  ;;  %3761 = vmatprep.subr.bf16.mxu1 %v6107_v51  ;;  %v6186_v49 = vld [vmem:[#allocation6 + $0x880] ss:$16 sps:$4 sm:$0xff]   ;;  %v6189_v51 = vld [vmem:[#allocation6 + $0x888] ss:$16 sps:$4 sm:$0xff]  }
 0x148   :  { %3434 = vmatpush1.bf16.msra.mxu0 %v6102_v52  ;;  %3762 = vmatpush1.bf16.msra.mxu1 %v6105_v54  ;;  %v6194_v52 = vld [vmem:[#allocation6 + $0x8a4] ss:$16 sps:$4 sm:$0xff]   ;;  %v6197_v54 = vld [vmem:[#allocation6 + $0x8ac] ss:$16 sps:$4 sm:$0xff]  }
 0x149   :  { %3435 = vmatprep.subr.bf16.mxu0 %v6110_v55  ;;  %3763 = vmatprep.subr.bf16.mxu1 %v6113_v56  ;;  %v6192_v55 = vld [vmem:[#allocation6 + $0x8a0] ss:$16 sps:$4 sm:$0xff]   ;;  %v6195_v56 = vld [vmem:[#allocation6 + $0x8a8] ss:$16 sps:$4 sm:$0xff]  }
 0x14c   :  { %3436 = vmatpush1.bf16.msra.mxu0 %v6108_v57  ;;  %3764 = vmatpush1.bf16.msra.mxu1 %v6111_v58  ;;  %v6200_v57 = vld [vmem:[#allocation6 + $0x8c4] ss:$16 sps:$4 sm:$0xff]   ;;  %v6203_v58 = vld [vmem:[#allocation6 + $0x8cc] ss:$16 sps:$4 sm:$0xff]  }
 0x14d   :  { %3437 = vmatprep.subr.bf16.mxu0 %v6116_v59  ;;  %3765 = vmatprep.subr.bf16.mxu1 %v6119_v60  ;;  %v6198_v59 = vld [vmem:[#allocation6 + $0x8c0] ss:$16 sps:$4 sm:$0xff]   ;;  %v6201_v60 = vld [vmem:[#allocation6 + $0x8c8] ss:$16 sps:$4 sm:$0xff]  }
 0x150   :  { %3438 = vmatpush1.bf16.msra.mxu0 %v6114_v61  ;;  %3766 = vmatpush1.bf16.msra.mxu1 %v6117_v62  ;;  %v6206_v61 = vld [vmem:[#allocation6 + $0x8e4] ss:$16 sps:$4 sm:$0xff]   ;;  %v6209_v62 = vld [vmem:[#allocation6 + $0x8ec] ss:$16 sps:$4 sm:$0xff]  }
 0x151   :  { %3439 = vmatprep.subr.bf16.mxu0 %v6122_v63  ;;  %3767 = vmatprep.subr.bf16.mxu1 %v6125_v0  ;;  %v6204_v63 = vld [vmem:[#allocation6 + $0x8e0] ss:$16 sps:$4 sm:$0xff]   ;;  %v6207_v0 = vld [vmem:[#allocation6 + $0x8e8] ss:$16 sps:$4 sm:$0xff]  }
 0x154   :  { %3440 = vmatpush1.bf16.msra.mxu0 %v6120_v1  ;;  %3768 = vmatpush1.bf16.msra.mxu1 %v6123_v2  ;;  %v6212_v1 = vld [vmem:[#allocation6 + $0x904] ss:$16 sps:$4 sm:$0xff]   ;;  %v6215_v2 = vld [vmem:[#allocation6 + $0x90c] ss:$16 sps:$4 sm:$0xff]  }
 0x155   :  { %3441 = vmatprep.subr.bf16.mxu0 %v6128_v3  ;;  %3769 = vmatprep.subr.bf16.mxu1 %v6131_v4  ;;  %v6210_v3 = vld [vmem:[#allocation6 + $0x900] ss:$16 sps:$4 sm:$0xff]   ;;  %v6213_v4 = vld [vmem:[#allocation6 + $0x908] ss:$16 sps:$4 sm:$0xff]  }
 0x158   :  { %3442 = vmatpush1.bf16.msra.mxu0 %v6126_v5  ;;  %3770 = vmatpush1.bf16.msra.mxu1 %v6129_v6  ;;  %v6218_v5 = vld [vmem:[#allocation6 + $0x924] ss:$16 sps:$4 sm:$0xff]   ;;  %v6221_v6 = vld [vmem:[#allocation6 + $0x92c] ss:$16 sps:$4 sm:$0xff]  }
 0x159   :  { %3443 = vmatprep.subr.bf16.mxu0 %v6134_v7  ;;  %3771 = vmatprep.subr.bf16.mxu1 %v6137_v8  ;;  %v6216_v7 = vld [vmem:[#allocation6 + $0x920] ss:$16 sps:$4 sm:$0xff]   ;;  %v6219_v8 = vld [vmem:[#allocation6 + $0x928] ss:$16 sps:$4 sm:$0xff]  }
 0x15c   :  { %3444 = vmatpush1.bf16.msra.mxu0 %v6132_v9  ;;  %3772 = vmatpush1.bf16.msra.mxu1 %v6135_v10  ;;  %v6224_v9 = vld [vmem:[#allocation6 + $0x944] ss:$16 sps:$4 sm:$0xff]   ;;  %v6227_v10 = vld [vmem:[#allocation6 + $0x94c] ss:$16 sps:$4 sm:$0xff]  }
 0x15d   :  { %3445 = vmatprep.subr.bf16.mxu0 %v6140_v11  ;;  %3773 = vmatprep.subr.bf16.mxu1 %v6143_v12  ;;  %v6222_v11 = vld [vmem:[#allocation6 + $0x940] ss:$16 sps:$4 sm:$0xff]   ;;  %v6225_v12 = vld [vmem:[#allocation6 + $0x948] ss:$16 sps:$4 sm:$0xff]  }
 0x160   :  { %3446 = vmatpush1.bf16.msra.mxu0 %v6138_v13  ;;  %3774 = vmatpush1.bf16.msra.mxu1 %v6141_v15  ;;  %v6230_v13 = vld [vmem:[#allocation6 + $0x964] ss:$16 sps:$4 sm:$0xff]   ;;  %v6233_v15 = vld [vmem:[#allocation6 + $0x96c] ss:$16 sps:$4 sm:$0xff]  }
 0x161   :  { %3447 = vmatprep.subr.bf16.mxu0 %v6146_v17  ;;  %3775 = vmatprep.subr.bf16.mxu1 %v6149_v18  ;;  %v6228_v17 = vld [vmem:[#allocation6 + $0x960] ss:$16 sps:$4 sm:$0xff]   ;;  %v6231_v18 = vld [vmem:[#allocation6 + $0x968] ss:$16 sps:$4 sm:$0xff]  }
 0x164   :  { %3448 = vmatpush1.bf16.msra.mxu0 %v6144_v19  ;;  %3776 = vmatpush1.bf16.msra.mxu1 %v6147_v20  ;;  %v6236_v19 = vld [vmem:[#allocation6 + $0x984] ss:$16 sps:$4 sm:$0xff]   ;;  %v6239_v20 = vld [vmem:[#allocation6 + $0x98c] ss:$16 sps:$4 sm:$0xff]  }
 0x165   :  { %3449 = vmatprep.subr.bf16.mxu0 %v6152_v53  ;;  %3777 = vmatprep.subr.bf16.mxu1 %v6155_v21  ;;  %v6234_v53 = vld [vmem:[#allocation6 + $0x980] ss:$16 sps:$4 sm:$0xff]   ;;  %v6237_v21 = vld [vmem:[#allocation6 + $0x988] ss:$16 sps:$4 sm:$0xff]  }
 0x168   :  { %3450 = vmatpush1.bf16.msra.mxu0 %v6150_v23  ;;  %3778 = vmatpush1.bf16.msra.mxu1 %v6153_v24  ;;  %v6242_v23 = vld [vmem:[#allocation6 + $0x9a4] ss:$16 sps:$4 sm:$0xff]   ;;  %v6245_v24 = vld [vmem:[#allocation6 + $0x9ac] ss:$16 sps:$4 sm:$0xff]  }
 0x169   :  { %3451 = vmatprep.subr.bf16.mxu0 %v6158_v25  ;;  %3779 = vmatprep.subr.bf16.mxu1 %v6161_v27  ;;  %v6240_v25 = vld [vmem:[#allocation6 + $0x9a0] ss:$16 sps:$4 sm:$0xff]   ;;  %v6243_v27 = vld [vmem:[#allocation6 + $0x9a8] ss:$16 sps:$4 sm:$0xff]  }
 0x16c   :  { %3452 = vmatpush1.bf16.msra.mxu0 %v6156_v29  ;;  %3780 = vmatpush1.bf16.msra.mxu1 %v6159_v14  ;;  %v6248_v29 = vld [vmem:[#allocation6 + $0x9c4] ss:$16 sps:$4 sm:$0xff]   ;;  %v6251_v14 = vld [vmem:[#allocation6 + $0x9cc] ss:$16 sps:$4 sm:$0xff]  }
 0x16d   :  { %3462 = vmatprep.subr.bf16.mxu0 %v6164_v30  ;;  %3790 = vmatprep.subr.bf16.mxu1 %v6167_v31  ;;  %v6246_v30 = vld [vmem:[#allocation6 + $0x9c0] ss:$16 sps:$4 sm:$0xff]   ;;  %v6249_v31 = vld [vmem:[#allocation6 + $0x9c8] ss:$16 sps:$4 sm:$0xff]  }
 0x16f   :  { %3454 = vmatmul.mubr.bf16.vlgmr.msra.gmra.mrb[0].mxu0 %v670_v33  ;;  %3782 = vmatmul.mubr.bf16.vlgmr.msra.gmra.mrb[0].mxu1 %v670_v33  ;;  %v6257_v33 = vld [vmem:[#allocation6 + $0x9ec] ss:$16 sps:$4 sm:$0xff]  }
 0x170   :  { %3463 = vmatpush1.bf16.msra.mxu0 %v6162_v16  ;;  %3791 = vmatpush1.bf16.msra.mxu1 %v6165_v34  ;;  %v6252_v16 = vld [vmem:[#allocation6 + $0x9e0] ss:$16 sps:$4 sm:$0xff]   ;;  %v6255_v34 = vld [vmem:[#allocation6 + $0x9e8] ss:$16 sps:$4 sm:$0xff]  }
 0x171   :  { %3464 = vmatprep.subr.bf16.mxu0 %v6170_v35  ;;  %3792 = vmatprep.subr.bf16.mxu1 %v6173_v36  ;;  %v6260_v35 = vld [vmem:[#allocation6 + $0xa04] ss:$16 sps:$4 sm:$0xff]   ;;  %v6263_v36 = vld [vmem:[#allocation6 + $0xa0c] ss:$16 sps:$4 sm:$0xff]  }
 0x172   :  { %3494 = vmatprep.mubr.bf16.mxu0 %v7050_v26  ;;  %3822 = vmatprep.mubr.bf16.mxu1 %v7050_v26 }
 0x174   :  { %3465 = vmatpush1.bf16.msra.mxu0 %v6168_v37  ;;  %3793 = vmatpush1.bf16.msra.mxu1 %v6171_v38  ;;  %v7056_v37 = vrot.slane %v7043_v22, %v7009_v50  ;;  %v6258_v38 = vld [vmem:[#allocation6 + $0xa00] ss:$16 sps:$4 sm:$0xff]   ;;  %v6267_v22 = vld [vmem:[#allocation6 + $0xa28] ss:$16 sps:$4 sm:$0xff]  }
 0x175   :  { %3466 = vmatprep.subr.bf16.mxu0 %v6176_v28  ;;  %3794 = vmatprep.subr.bf16.mxu1 %v6179_v39  ;;  %v6261_v28 = vld [vmem:[#allocation6 + $0xa08] ss:$16 sps:$4 sm:$0xff]   ;;  %v6266_v39 = vld [vmem:[#allocation6 + $0xa24] ss:$16 sps:$4 sm:$0xff]  }
 0x178   :  { %3467 = vmatpush1.bf16.msra.mxu0 %v6174_v40  ;;  %3795 = vmatpush1.bf16.msra.mxu1 %v6177_v41  ;;  %v6269_v40 = vld [vmem:[#allocation6 + $0xa2c] ss:$16 sps:$4 sm:$0xff]   ;;  %v720_v41 = vcombine.high %v7050_v26, %v7050_v26  ;;  %v6278_v26 = vld [vmem:[#allocation6 + $0xa64] ss:$16 sps:$4 sm:$0xff]  }
 0x179   :  { %3468 = vmatprep.subr.bf16.mxu0 %v6182_v42  ;;  %3796 = vmatprep.subr.bf16.mxu1 %v6185_v43  ;;  %v6264_v42 = vld [vmem:[#allocation6 + $0xa20] ss:$16 sps:$4 sm:$0xff]   ;;  %v6272_v43 = vld [vmem:[#allocation6 + $0xa44] ss:$16 sps:$4 sm:$0xff]  }
 0x17c   :  { %3469 = vmatpush1.bf16.msra.mxu0 %v6180_v45  ;;  %3797 = vmatpush1.bf16.msra.mxu1 %v6183_v46  ;;  %v6275_v45 = vld [vmem:[#allocation6 + $0xa4c] ss:$16 sps:$4 sm:$0xff]   ;;  %v6270_v46 = vld [vmem:[#allocation6 + $0xa40] ss:$16 sps:$4 sm:$0xff]  }
 0x17d   :  { %3470 = vmatprep.subr.bf16.mxu0 %v6188_v47  ;;  %3798 = vmatprep.subr.bf16.mxu1 %v6191_v48  ;;  %v6273_v47 = vld [vmem:[#allocation6 + $0xa48] ss:$16 sps:$4 sm:$0xff]   ;;  %v6281_v48 = vld [vmem:[#allocation6 + $0xa6c] ss:$16 sps:$4 sm:$0xff]  }
 0x180   :  { %3471 = vmatpush1.bf16.msra.mxu0 %v6186_v49  ;;  %3799 = vmatpush1.bf16.msra.mxu1 %v6189_v51  ;;  %v6276_v49 = vld [vmem:[#allocation6 + $0xa60] ss:$16 sps:$4 sm:$0xff]   ;;  %v6279_v51 = vld [vmem:[#allocation6 + $0xa68] ss:$16 sps:$4 sm:$0xff]  }
 0x181   :  { %3472 = vmatprep.subr.bf16.mxu0 %v6194_v52  ;;  %3800 = vmatprep.subr.bf16.mxu1 %v6197_v54  ;;  %v6284_v52 = vld [vmem:[#allocation6 + $0xa84] ss:$16 sps:$4 sm:$0xff]   ;;  %v6287_v54 = vld [vmem:[#allocation6 + $0xa8c] ss:$16 sps:$4 sm:$0xff]  }
 0x184   :  { %3473 = vmatpush1.bf16.msra.mxu0 %v6192_v55  ;;  %3801 = vmatpush1.bf16.msra.mxu1 %v6195_v56  ;;  %v6282_v55 = vld [vmem:[#allocation6 + $0xa80] ss:$16 sps:$4 sm:$0xff]   ;;  %v6285_v56 = vld [vmem:[#allocation6 + $0xa88] ss:$16 sps:$4 sm:$0xff]  }
 0x185   :  { %3474 = vmatprep.subr.bf16.mxu0 %v6200_v57  ;;  %3802 = vmatprep.subr.bf16.mxu1 %v6203_v58  ;;  %v6290_v57 = vld [vmem:[#allocation6 + $0xaa4] ss:$16 sps:$4 sm:$0xff]   ;;  %v6293_v58 = vld [vmem:[#allocation6 + $0xaac] ss:$16 sps:$4 sm:$0xff]  }
 0x188   :  { %3475 = vmatpush1.bf16.msra.mxu0 %v6198_v59  ;;  %3803 = vmatpush1.bf16.msra.mxu1 %v6201_v60  ;;  %v6288_v59 = vld [vmem:[#allocation6 + $0xaa0] ss:$16 sps:$4 sm:$0xff]   ;;  %v6291_v60 = vld [vmem:[#allocation6 + $0xaa8] ss:$16 sps:$4 sm:$0xff]  }
 0x189   :  { %3476 = vmatprep.subr.bf16.mxu0 %v6206_v61  ;;  %3804 = vmatprep.subr.bf16.mxu1 %v6209_v62  ;;  %v6296_v61 = vld [vmem:[#allocation6 + $0xac4] ss:$16 sps:$4 sm:$0xff]   ;;  %v6299_v62 = vld [vmem:[#allocation6 + $0xacc] ss:$16 sps:$4 sm:$0xff]  }
 0x18c   :  { %3477 = vmatpush1.bf16.msra.mxu0 %v6204_v63  ;;  %3805 = vmatpush1.bf16.msra.mxu1 %v6207_v0  ;;  %v6294_v63 = vld [vmem:[#allocation6 + $0xac0] ss:$16 sps:$4 sm:$0xff]   ;;  %v6297_v0 = vld [vmem:[#allocation6 + $0xac8] ss:$16 sps:$4 sm:$0xff]  }
 0x18d   :  { %3478 = vmatprep.subr.bf16.mxu0 %v6212_v1  ;;  %3806 = vmatprep.subr.bf16.mxu1 %v6215_v2  ;;  %v6302_v1 = vld [vmem:[#allocation6 + $0xae4] ss:$16 sps:$4 sm:$0xff]   ;;  %v6305_v2 = vld [vmem:[#allocation6 + $0xaec] ss:$16 sps:$4 sm:$0xff]  }
 0x190   :  { %3479 = vmatpush1.bf16.msra.mxu0 %v6210_v3  ;;  %3807 = vmatpush1.bf16.msra.mxu1 %v6213_v4  ;;  %v6300_v3 = vld [vmem:[#allocation6 + $0xae0] ss:$16 sps:$4 sm:$0xff]   ;;  %v6303_v4 = vld [vmem:[#allocation6 + $0xae8] ss:$16 sps:$4 sm:$0xff]  }
 0x191   :  { %3480 = vmatprep.subr.bf16.mxu0 %v6218_v5  ;;  %3808 = vmatprep.subr.bf16.mxu1 %v6221_v6  ;;  %v6308_v5 = vld [vmem:[#allocation6 + $0xb04] ss:$16 sps:$4 sm:$0xff]   ;;  %v6311_v6 = vld [vmem:[#allocation6 + $0xb0c] ss:$16 sps:$4 sm:$0xff]  }
 0x194   :  { %3481 = vmatpush1.bf16.msra.mxu0 %v6216_v7  ;;  %3809 = vmatpush1.bf16.msra.mxu1 %v6219_v8  ;;  %v6306_v7 = vld [vmem:[#allocation6 + $0xb00] ss:$16 sps:$4 sm:$0xff]   ;;  %v6309_v8 = vld [vmem:[#allocation6 + $0xb08] ss:$16 sps:$4 sm:$0xff]  }
 0x195   :  { %3482 = vmatprep.subr.bf16.mxu0 %v6224_v9  ;;  %3810 = vmatprep.subr.bf16.mxu1 %v6227_v10  ;;  %v6314_v9 = vld [vmem:[#allocation6 + $0xb24] ss:$16 sps:$4 sm:$0xff]   ;;  %v6317_v10 = vld [vmem:[#allocation6 + $0xb2c] ss:$16 sps:$4 sm:$0xff]  }
 0x198   :  { %3483 = vmatpush1.bf16.msra.mxu0 %v6222_v11  ;;  %3811 = vmatpush1.bf16.msra.mxu1 %v6225_v12  ;;  %v6312_v11 = vld [vmem:[#allocation6 + $0xb20] ss:$16 sps:$4 sm:$0xff]   ;;  %v6315_v12 = vld [vmem:[#allocation6 + $0xb28] ss:$16 sps:$4 sm:$0xff]  }
 0x199   :  { %3484 = vmatprep.subr.bf16.mxu0 %v6230_v13  ;;  %3812 = vmatprep.subr.bf16.mxu1 %v6233_v15  ;;  %v6320_v13 = vld [vmem:[#allocation6 + $0xb44] ss:$16 sps:$4 sm:$0xff]   ;;  %v6323_v15 = vld [vmem:[#allocation6 + $0xb4c] ss:$16 sps:$4 sm:$0xff]  }
 0x19c   :  { %3485 = vmatpush1.bf16.msra.mxu0 %v6228_v17  ;;  %3813 = vmatpush1.bf16.msra.mxu1 %v6231_v18  ;;  %v6318_v17 = vld [vmem:[#allocation6 + $0xb40] ss:$16 sps:$4 sm:$0xff]   ;;  %v6321_v18 = vld [vmem:[#allocation6 + $0xb48] ss:$16 sps:$4 sm:$0xff]  }
 0x19d   :  { %3486 = vmatprep.subr.bf16.mxu0 %v6236_v19  ;;  %3814 = vmatprep.subr.bf16.mxu1 %v6239_v20  ;;  %v6326_v19 = vld [vmem:[#allocation6 + $0xb64] ss:$16 sps:$4 sm:$0xff]   ;;  %v6329_v20 = vld [vmem:[#allocation6 + $0xb6c] ss:$16 sps:$4 sm:$0xff]  }
 0x1a0   :  { %3487 = vmatpush1.bf16.msra.mxu0 %v6234_v53  ;;  %3815 = vmatpush1.bf16.msra.mxu1 %v6237_v21  ;;  %v6324_v53 = vld [vmem:[#allocation6 + $0xb60] ss:$16 sps:$4 sm:$0xff]   ;;  %v6327_v21 = vld [vmem:[#allocation6 + $0xb68] ss:$16 sps:$4 sm:$0xff]  }
 0x1a1   :  { %3488 = vmatprep.subr.bf16.mxu0 %v6242_v23  ;;  %3816 = vmatprep.subr.bf16.mxu1 %v6245_v24  ;;  %v6332_v23 = vld [vmem:[#allocation6 + $0xb84] ss:$16 sps:$4 sm:$0xff]   ;;  %v6335_v24 = vld [vmem:[#allocation6 + $0xb8c] ss:$16 sps:$4 sm:$0xff]  }
 0x1a4   :  { %3489 = vmatpush1.bf16.msra.mxu0 %v6240_v25  ;;  %3817 = vmatpush1.bf16.msra.mxu1 %v6243_v27  ;;  %v6330_v25 = vld [vmem:[#allocation6 + $0xb80] ss:$16 sps:$4 sm:$0xff]   ;;  %v6333_v27 = vld [vmem:[#allocation6 + $0xb88] ss:$16 sps:$4 sm:$0xff]  }
 0x1a5   :  { %3490 = vmatprep.subr.bf16.mxu0 %v6248_v29  ;;  %3818 = vmatprep.subr.bf16.mxu1 %v6251_v14  ;;  %v6338_v29 = vld [vmem:[#allocation6 + $0xba4] ss:$16 sps:$4 sm:$0xff]   ;;  %v6341_v14 = vld [vmem:[#allocation6 + $0xbac] ss:$16 sps:$4 sm:$0xff]  }
 0x1a8   :  { %3491 = vmatpush1.bf16.msra.mxu0 %v6246_v30  ;;  %3819 = vmatpush1.bf16.msra.mxu1 %v6249_v31  ;;  %v6336_v30 = vld [vmem:[#allocation6 + $0xba0] ss:$16 sps:$4 sm:$0xff]   ;;  %v6339_v31 = vld [vmem:[#allocation6 + $0xba8] ss:$16 sps:$4 sm:$0xff]  }
 0x1a9   :  { %3492 = vmatprep.subr.bf16.mxu0 %v6254_v32  ;;  %3820 = vmatprep.subr.bf16.mxu1 %v6257_v33  ;;  %v6344_v32 = vld [vmem:[#allocation6 + $0xbc4] ss:$16 sps:$4 sm:$0xff]   ;;  %v6347_v33 = vld [vmem:[#allocation6 + $0xbcc] ss:$16 sps:$4 sm:$0xff]  }
 0x1ac   :  { %3493 = vmatpush1.bf16.msra.mxu0 %v6252_v16  ;;  %3821 = vmatpush1.bf16.msra.mxu1 %v6255_v34  ;;  %v6739_v16 = vld [vmem:[#allocation4 + $0x8] sm:$0xff] }
 0x1ad   :  { %3503 = vmatprep.subr.bf16.mxu0 %v6260_v35  ;;  %3831 = vmatprep.subr.bf16.mxu1 %v6263_v36  ;;  %v673_v34 = vcombine.high %v6739_v16, %v6739_v16  ;;  %v6342_v35 = vld [vmem:[#allocation6 + $0xbc0] ss:$16 sps:$4 sm:$0xff]   ;;  %v6345_v36 = vld [vmem:[#allocation6 + $0xbc8] ss:$16 sps:$4 sm:$0xff]  }
 0x1ae   :  { %v6426_v16 = vld [vmem:[#allocation6 + $0xd80] ss:$16 sps:$4 sm:$0xff]  }
 0x1af   :  { %3495 = vmatmul.mubr.bf16.vlgmr.msra.gmra.mrb[0].mxu0 %v7056_v37  ;;  %3823 = vmatmul.mubr.bf16.vlgmr.msra.gmra.mrb[0].mxu1 %v7056_v37 }
 0x1b0   :  { %3504 = vmatpush1.bf16.msra.mxu0 %v6258_v38  ;;  %3832 = vmatpush1.bf16.msra.mxu1 %v6261_v28  ;;  %v6350_v38 = vld [vmem:[#allocation6 + $0xbe4] ss:$16 sps:$4 sm:$0xff]   ;;  %v6353_v28 = vld [vmem:[#allocation6 + $0xbec] ss:$16 sps:$4 sm:$0xff]  }
 0x1b1   :  { %3505 = vmatprep.subr.bf16.mxu0 %v6266_v39  ;;  %3833 = vmatprep.subr.bf16.mxu1 %v6269_v40  ;;  %v7063_v39 = vrot.slane %v673_v34, %v7009_v50  ;;  %v6348_v40 = vld [vmem:[#allocation6 + $0xbe0] ss:$16 sps:$4 sm:$0xff]   ;;  %v6429_v34 = vld [vmem:[#allocation6 + $0xd88] ss:$16 sps:$4 sm:$0xff]  }
 0x1b2   :  { %3535 = vmatprep.mubr.bf16.mxu0 %v720_v41  ;;  %3863 = vmatprep.mubr.bf16.mxu1 %v720_v41  ;;  %v6351_v41 = vld [vmem:[#allocation6 + $0xbe8] ss:$16 sps:$4 sm:$0xff]  }
 0x1b4   :  { %3506 = vmatpush1.bf16.msra.mxu0 %v6264_v42  ;;  %3834 = vmatpush1.bf16.msra.mxu1 %v6267_v22  ;;  %v6356_v42 = vld [vmem:[#allocation6 + $0xc04] ss:$16 sps:$4 sm:$0xff]   ;;  %v6359_v22 = vld [vmem:[#allocation6 + $0xc0c] ss:$16 sps:$4 sm:$0xff]  }
 0x1b5   :  { %3507 = vmatprep.subr.bf16.mxu0 %v6272_v43  ;;  %3835 = vmatprep.subr.bf16.mxu1 %v6275_v45  ;;  %v6354_v43 = vld [vmem:[#allocation6 + $0xc00] ss:$16 sps:$4 sm:$0xff]   ;;  %v689_v45 = vcombine.high %v7063_v39, %v7063_v39 }
 0x1b8   :  { %3508 = vmatpush1.bf16.msra.mxu0 %v6270_v46  ;;  %3836 = vmatpush1.bf16.msra.mxu1 %v6273_v47  ;;  %v718_v46 = vcombine.high %v7056_v37, %v7056_v37  ;;  %v6357_v47 = vld [vmem:[#allocation6 + $0xc08] ss:$16 sps:$4 sm:$0xff]   ;;  %v6371_v37 = vld [vmem:[#allocation6 + $0xc4c] ss:$16 sps:$4 sm:$0xff]  }
 0x1b9   :  { %3509 = vmatprep.subr.bf16.mxu0 %v6278_v26  ;;  %3837 = vmatprep.subr.bf16.mxu1 %v6281_v48  ;;  %v6362_v26 = vld [vmem:[#allocation6 + $0xc24] ss:$16 sps:$4 sm:$0xff]   ;;  %v6365_v48 = vld [vmem:[#allocation6 + $0xc2c] ss:$16 sps:$4 sm:$0xff]  }
 0x1bc   :  { %3510 = vmatpush1.bf16.msra.mxu0 %v6276_v49  ;;  %3838 = vmatpush1.bf16.msra.mxu1 %v6279_v51  ;;  %v7070_v49 = vrot.slane %v689_v45, %v7009_v50  ;;  %v6360_v51 = vld [vmem:[#allocation6 + $0xc20] ss:$16 sps:$4 sm:$0xff]   ;;  %v6449_v45 = vld [vmem:[#allocation6 + $0xdec] ss:$16 sps:$4 sm:$0xff]  }
 0x1bd   :  { %3511 = vmatprep.subr.bf16.mxu0 %v6284_v52  ;;  %3839 = vmatprep.subr.bf16.mxu1 %v6287_v54  ;;  %v6363_v52 = vld [vmem:[#allocation6 + $0xc28] ss:$16 sps:$4 sm:$0xff]   ;;  %v6368_v54 = vld [vmem:[#allocation6 + $0xc44] ss:$16 sps:$4 sm:$0xff]  }
 0x1c0   :  { %3512 = vmatpush1.bf16.msra.mxu0 %v6282_v55  ;;  %3840 = vmatpush1.bf16.msra.mxu1 %v6285_v56  ;;  %v6366_v55 = vld [vmem:[#allocation6 + $0xc40] ss:$16 sps:$4 sm:$0xff]   ;;  %v6369_v56 = vld [vmem:[#allocation6 + $0xc48] ss:$16 sps:$4 sm:$0xff]  }
 0x1c1   :  { %3513 = vmatprep.subr.bf16.mxu0 %v6290_v57  ;;  %3841 = vmatprep.subr.bf16.mxu1 %v6293_v58  ;;  %v6374_v57 = vld [vmem:[#allocation6 + $0xc64] ss:$16 sps:$4 sm:$0xff]   ;;  %v6377_v58 = vld [vmem:[#allocation6 + $0xc6c] ss:$16 sps:$4 sm:$0xff]  }
 0x1c4   :  { %3514 = vmatpush1.bf16.msra.mxu0 %v6288_v59  ;;  %3842 = vmatpush1.bf16.msra.mxu1 %v6291_v60  ;;  %v6372_v59 = vld [vmem:[#allocation6 + $0xc60] ss:$16 sps:$4 sm:$0xff]   ;;  %v6375_v60 = vld [vmem:[#allocation6 + $0xc68] ss:$16 sps:$4 sm:$0xff]  }
 0x1c5   :  { %3515 = vmatprep.subr.bf16.mxu0 %v6296_v61  ;;  %3843 = vmatprep.subr.bf16.mxu1 %v6299_v62  ;;  %v6380_v61 = vld [vmem:[#allocation6 + $0xc84] ss:$16 sps:$4 sm:$0xff]   ;;  %v6383_v62 = vld [vmem:[#allocation6 + $0xc8c] ss:$16 sps:$4 sm:$0xff]  }
 0x1c8   :  { %3516 = vmatpush1.bf16.msra.mxu0 %v6294_v63  ;;  %3844 = vmatpush1.bf16.msra.mxu1 %v6297_v0  ;;  %v6378_v63 = vld [vmem:[#allocation6 + $0xc80] ss:$16 sps:$4 sm:$0xff]   ;;  %v6381_v0 = vld [vmem:[#allocation6 + $0xc88] ss:$16 sps:$4 sm:$0xff]  }
 0x1c9   :  { %3517 = vmatprep.subr.bf16.mxu0 %v6302_v1  ;;  %3845 = vmatprep.subr.bf16.mxu1 %v6305_v2  ;;  %v6386_v1 = vld [vmem:[#allocation6 + $0xca4] ss:$16 sps:$4 sm:$0xff]   ;;  %v6389_v2 = vld [vmem:[#allocation6 + $0xcac] ss:$16 sps:$4 sm:$0xff]  }
 0x1cc   :  { %3518 = vmatpush1.bf16.msra.mxu0 %v6300_v3  ;;  %3846 = vmatpush1.bf16.msra.mxu1 %v6303_v4  ;;  %v6384_v3 = vld [vmem:[#allocation6 + $0xca0] ss:$16 sps:$4 sm:$0xff]   ;;  %v6387_v4 = vld [vmem:[#allocation6 + $0xca8] ss:$16 sps:$4 sm:$0xff]  }
 0x1cd   :  { %3519 = vmatprep.subr.bf16.mxu0 %v6308_v5  ;;  %3847 = vmatprep.subr.bf16.mxu1 %v6311_v6  ;;  %v6392_v5 = vld [vmem:[#allocation6 + $0xcc4] ss:$16 sps:$4 sm:$0xff]   ;;  %v6395_v6 = vld [vmem:[#allocation6 + $0xccc] ss:$16 sps:$4 sm:$0xff]  }
 0x1d0   :  { %3520 = vmatpush1.bf16.msra.mxu0 %v6306_v7  ;;  %3848 = vmatpush1.bf16.msra.mxu1 %v6309_v8  ;;  %v6390_v7 = vld [vmem:[#allocation6 + $0xcc0] ss:$16 sps:$4 sm:$0xff]   ;;  %v6393_v8 = vld [vmem:[#allocation6 + $0xcc8] ss:$16 sps:$4 sm:$0xff]  }
 0x1d1   :  { %3521 = vmatprep.subr.bf16.mxu0 %v6314_v9  ;;  %3849 = vmatprep.subr.bf16.mxu1 %v6317_v10  ;;  %v6398_v9 = vld [vmem:[#allocation6 + $0xce4] ss:$16 sps:$4 sm:$0xff]   ;;  %v6401_v10 = vld [vmem:[#allocation6 + $0xcec] ss:$16 sps:$4 sm:$0xff]  }
 0x1d4   :  { %3522 = vmatpush1.bf16.msra.mxu0 %v6312_v11  ;;  %3850 = vmatpush1.bf16.msra.mxu1 %v6315_v12  ;;  %v6396_v11 = vld [vmem:[#allocation6 + $0xce0] ss:$16 sps:$4 sm:$0xff]   ;;  %v6399_v12 = vld [vmem:[#allocation6 + $0xce8] ss:$16 sps:$4 sm:$0xff]  }
 0x1d5   :  { %3523 = vmatprep.subr.bf16.mxu0 %v6320_v13  ;;  %3851 = vmatprep.subr.bf16.mxu1 %v6323_v15  ;;  %v6404_v13 = vld [vmem:[#allocation6 + $0xd04] ss:$16 sps:$4 sm:$0xff]   ;;  %v6407_v15 = vld [vmem:[#allocation6 + $0xd0c] ss:$16 sps:$4 sm:$0xff]  }
 0x1d8   :  { %3524 = vmatpush1.bf16.msra.mxu0 %v6318_v17  ;;  %3852 = vmatpush1.bf16.msra.mxu1 %v6321_v18  ;;  %v6402_v17 = vld [vmem:[#allocation6 + $0xd00] ss:$16 sps:$4 sm:$0xff]   ;;  %v6405_v18 = vld [vmem:[#allocation6 + $0xd08] ss:$16 sps:$4 sm:$0xff]  }
 0x1d9   :  { %3525 = vmatprep.subr.bf16.mxu0 %v6326_v19  ;;  %3853 = vmatprep.subr.bf16.mxu1 %v6329_v20  ;;  %v6410_v19 = vld [vmem:[#allocation6 + $0xd24] ss:$16 sps:$4 sm:$0xff]   ;;  %v6413_v20 = vld [vmem:[#allocation6 + $0xd2c] ss:$16 sps:$4 sm:$0xff]  }
 0x1dc   :  { %3526 = vmatpush1.bf16.msra.mxu0 %v6324_v53  ;;  %3854 = vmatpush1.bf16.msra.mxu1 %v6327_v21  ;;  %v6408_v53 = vld [vmem:[#allocation6 + $0xd20] ss:$16 sps:$4 sm:$0xff]   ;;  %v6411_v21 = vld [vmem:[#allocation6 + $0xd28] ss:$16 sps:$4 sm:$0xff]  }
 0x1dd   :  { %3527 = vmatprep.subr.bf16.mxu0 %v6332_v23  ;;  %3855 = vmatprep.subr.bf16.mxu1 %v6335_v24  ;;  %v6416_v23 = vld [vmem:[#allocation6 + $0xd44] ss:$16 sps:$4 sm:$0xff]   ;;  %v6419_v24 = vld [vmem:[#allocation6 + $0xd4c] ss:$16 sps:$4 sm:$0xff]  }
 0x1e0   :  { %3528 = vmatpush1.bf16.msra.mxu0 %v6330_v25  ;;  %3856 = vmatpush1.bf16.msra.mxu1 %v6333_v27  ;;  %v6414_v25 = vld [vmem:[#allocation6 + $0xd40] ss:$16 sps:$4 sm:$0xff]   ;;  %v6417_v27 = vld [vmem:[#allocation6 + $0xd48] ss:$16 sps:$4 sm:$0xff]  }
 0x1e1   :  { %3529 = vmatprep.subr.bf16.mxu0 %v6338_v29  ;;  %3857 = vmatprep.subr.bf16.mxu1 %v6341_v14  ;;  %v6422_v29 = vld [vmem:[#allocation6 + $0xd64] ss:$16 sps:$4 sm:$0xff]   ;;  %v6425_v14 = vld [vmem:[#allocation6 + $0xd6c] ss:$16 sps:$4 sm:$0xff]  }
 0x1e4   :  { %3530 = vmatpush1.bf16.msra.mxu0 %v6336_v30  ;;  %3858 = vmatpush1.bf16.msra.mxu1 %v6339_v31  ;;  %v6420_v30 = vld [vmem:[#allocation6 + $0xd60] ss:$16 sps:$4 sm:$0xff]   ;;  %v6423_v31 = vld [vmem:[#allocation6 + $0xd68] ss:$16 sps:$4 sm:$0xff]  }
 0x1e5   :  { %3531 = vmatprep.subr.bf16.mxu0 %v6344_v32  ;;  %3859 = vmatprep.subr.bf16.mxu1 %v6347_v33  ;;  %v6428_v32 = vld [vmem:[#allocation6 + $0xd84] ss:$16 sps:$4 sm:$0xff]   ;;  %v6431_v33 = vld [vmem:[#allocation6 + $0xd8c] ss:$16 sps:$4 sm:$0xff]  }
 0x1e8   :  { %3532 = vmatpush1.bf16.msra.mxu0 %v6342_v35  ;;  %3860 = vmatpush1.bf16.msra.mxu1 %v6345_v36  ;;  %v6434_v35 = vld [vmem:[#allocation6 + $0xda4] ss:$16 sps:$4 sm:$0xff]   ;;  %v6437_v36 = vld [vmem:[#allocation6 + $0xdac] ss:$16 sps:$4 sm:$0xff]  }
 0x1e9   :  { %3533 = vmatprep.subr.bf16.mxu0 %v6350_v38  ;;  %3861 = vmatprep.subr.bf16.mxu1 %v6353_v28  ;;  %v6432_v38 = vld [vmem:[#allocation6 + $0xda0] ss:$16 sps:$4 sm:$0xff]   ;;  %v6435_v28 = vld [vmem:[#allocation6 + $0xda8] ss:$16 sps:$4 sm:$0xff]  }
 0x1ec   :  { %3534 = vmatpush1.bf16.msra.mxu0 %v6348_v40  ;;  %3862 = vmatpush1.bf16.msra.mxu1 %v6351_v41  ;;  %v6440_v40 = vld [vmem:[#allocation6 + $0xdc4] ss:$16 sps:$4 sm:$0xff]   ;;  %v6443_v41 = vld [vmem:[#allocation6 + $0xdcc] ss:$16 sps:$4 sm:$0xff]  }
 0x1ed   :  { %3544 = vmatprep.subr.bf16.mxu0 %v6356_v42  ;;  %3872 = vmatprep.subr.bf16.mxu1 %v6359_v22  ;;  %v6438_v42 = vld [vmem:[#allocation6 + $0xdc0] ss:$16 sps:$4 sm:$0xff]   ;;  %v6441_v22 = vld [vmem:[#allocation6 + $0xdc8] ss:$16 sps:$4 sm:$0xff]  }
 0x1ef   :  { %3536 = vmatmul.mubr.bf16.vlgmr.msra.gmra.mrb[0].mxu0 %v718_v46  ;;  %3864 = vmatmul.mubr.bf16.vlgmr.msra.gmra.mrb[0].mxu1 %v718_v46  ;;  %v6444_v46 = vld [vmem:[#allocation6 + $0xde0] ss:$16 sps:$4 sm:$0xff]  }
 0x1f0   :  { %3545 = vmatpush1.bf16.msra.mxu0 %v6354_v43  ;;  %3873 = vmatpush1.bf16.msra.mxu1 %v6357_v47  ;;  %v6446_v43 = vld [vmem:[#allocation6 + $0xde4] ss:$16 sps:$4 sm:$0xff]   ;;  %v6447_v47 = vld [vmem:[#allocation6 + $0xde8] ss:$16 sps:$4 sm:$0xff]  }
 0x1f1   :  { %3546 = vmatprep.subr.bf16.mxu0 %v6362_v26  ;;  %3874 = vmatprep.subr.bf16.mxu1 %v6365_v48  ;;  %v6453_v26 = vld [vmem:[#allocation6 + $0xe04] ss:$16 sps:$4 sm:$0xff]   ;;  %v6456_v48 = vld [vmem:[#allocation6 + $0xe0c] ss:$16 sps:$4 sm:$0xff]  }
 0x1f2   :  { %3576 = vmatprep.mubr.bf16.mxu0 %v7070_v49  ;;  %3904 = vmatprep.mubr.bf16.mxu1 %v7070_v49 }
 0x1f4   :  { %3547 = vmatpush1.bf16.msra.mxu0 %v6360_v51  ;;  %3875 = vmatpush1.bf16.msra.mxu1 %v6363_v52  ;;  %v7076_v51 = vrot.slane %v7063_v39, %v7009_v50  ;;  %v6451_v52 = vld [vmem:[#allocation6 + $0xe00] ss:$16 sps:$4 sm:$0xff]   ;;  %v6460_v50 = vld [vmem:[#allocation6 + $0xe28] ss:$16 sps:$4 sm:$0xff]   ;;  %v6465_v39 = vld [vmem:[#allocation6 + $0xe44] ss:$16 sps:$4 sm:$0xff]  }
 0x1f5   :  { %3548 = vmatprep.subr.bf16.mxu0 %v6368_v54  ;;  %3876 = vmatprep.subr.bf16.mxu1 %v6371_v37  ;;  %v6454_v54 = vld [vmem:[#allocation6 + $0xe08] ss:$16 sps:$4 sm:$0xff]   ;;  %v6459_v37 = vld [vmem:[#allocation6 + $0xe24] ss:$16 sps:$4 sm:$0xff]  }
 0x1f8   :  { %3549 = vmatpush1.bf16.msra.mxu0 %v6366_v55  ;;  %3877 = vmatpush1.bf16.msra.mxu1 %v6369_v56  ;;  %v6462_v55 = vld [vmem:[#allocation6 + $0xe2c] ss:$16 sps:$4 sm:$0xff]   ;;  %v721_v56 = vcombine.high %v7070_v49, %v7070_v49  ;;  %v6471_v49 = vld [vmem:[#allocation6 + $0xe64] ss:$16 sps:$4 sm:$0xff]  }
 0x1f9   :  { %3550 = vmatprep.subr.bf16.mxu0 %v6374_v57  ;;  %3878 = vmatprep.subr.bf16.mxu1 %v6377_v58  ;;  %v6457_v57 = vld [vmem:[#allocation6 + $0xe20] ss:$16 sps:$4 sm:$0xff]   ;;  %v6468_v58 = vld [vmem:[#allocation6 + $0xe4c] ss:$16 sps:$4 sm:$0xff]  }
 0x1fc   :  { %3551 = vmatpush1.bf16.msra.mxu0 %v6372_v59  ;;  %3879 = vmatpush1.bf16.msra.mxu1 %v6375_v60  ;;  %v6463_v59 = vld [vmem:[#allocation6 + $0xe40] ss:$16 sps:$4 sm:$0xff]   ;;  %v6466_v60 = vld [vmem:[#allocation6 + $0xe48] ss:$16 sps:$4 sm:$0xff]  }
 0x1fd   :  { %3552 = vmatprep.subr.bf16.mxu0 %v6380_v61  ;;  %3880 = vmatprep.subr.bf16.mxu1 %v6383_v62  ;;  %v6474_v61 = vld [vmem:[#allocation6 + $0xe6c] ss:$16 sps:$4 sm:$0xff]   ;;  %v6469_v62 = vld [vmem:[#allocation6 + $0xe60] ss:$16 sps:$4 sm:$0xff]  }
 0x200   :  { %3553 = vmatpush1.bf16.msra.mxu0 %v6378_v63  ;;  %3881 = vmatpush1.bf16.msra.mxu1 %v6381_v0  ;;  %v6472_v63 = vld [vmem:[#allocation6 + $0xe68] ss:$16 sps:$4 sm:$0xff]   ;;  %v6477_v0 = vld [vmem:[#allocation6 + $0xe84] ss:$16 sps:$4 sm:$0xff]  }
 0x201   :  { %3554 = vmatprep.subr.bf16.mxu0 %v6386_v1  ;;  %3882 = vmatprep.subr.bf16.mxu1 %v6389_v2  ;;  %v6480_v1 = vld [vmem:[#allocation6 + $0xe8c] ss:$16 sps:$4 sm:$0xff]   ;;  %v6475_v2 = vld [vmem:[#allocation6 + $0xe80] ss:$16 sps:$4 sm:$0xff]  }
 0x204   :  { %3555 = vmatpush1.bf16.msra.mxu0 %v6384_v3  ;;  %3883 = vmatpush1.bf16.msra.mxu1 %v6387_v4  ;;  %v6478_v3 = vld [vmem:[#allocation6 + $0xe88] ss:$16 sps:$4 sm:$0xff]   ;;  %v6483_v4 = vld [vmem:[#allocation6 + $0xea4] ss:$16 sps:$4 sm:$0xff]  }
 0x205   :  { %3556 = vmatprep.subr.bf16.mxu0 %v6392_v5  ;;  %3884 = vmatprep.subr.bf16.mxu1 %v6395_v6  ;;  %v6486_v5 = vld [vmem:[#allocation6 + $0xeac] ss:$16 sps:$4 sm:$0xff]   ;;  %v6481_v6 = vld [vmem:[#allocation6 + $0xea0] ss:$16 sps:$4 sm:$0xff]  }
 0x208   :  { %3557 = vmatpush1.bf16.msra.mxu0 %v6390_v7  ;;  %3885 = vmatpush1.bf16.msra.mxu1 %v6393_v8  ;;  %v6484_v7 = vld [vmem:[#allocation6 + $0xea8] ss:$16 sps:$4 sm:$0xff]   ;;  %v6489_v8 = vld [vmem:[#allocation6 + $0xec4] ss:$16 sps:$4 sm:$0xff]  }
 0x209   :  { %3558 = vmatprep.subr.bf16.mxu0 %v6398_v9  ;;  %3886 = vmatprep.subr.bf16.mxu1 %v6401_v10  ;;  %v6492_v9 = vld [vmem:[#allocation6 + $0xecc] ss:$16 sps:$4 sm:$0xff]   ;;  %v6487_v10 = vld [vmem:[#allocation6 + $0xec0] ss:$16 sps:$4 sm:$0xff]  }
 0x20c   :  { %3559 = vmatpush1.bf16.msra.mxu0 %v6396_v11  ;;  %3887 = vmatpush1.bf16.msra.mxu1 %v6399_v12  ;;  %v6490_v11 = vld [vmem:[#allocation6 + $0xec8] ss:$16 sps:$4 sm:$0xff]   ;;  %v6495_v12 = vld [vmem:[#allocation6 + $0xee4] ss:$16 sps:$4 sm:$0xff]  }
 0x20d   :  { %3560 = vmatprep.subr.bf16.mxu0 %v6404_v13  ;;  %3888 = vmatprep.subr.bf16.mxu1 %v6407_v15  ;;  %v6498_v13 = vld [vmem:[#allocation6 + $0xeec] ss:$16 sps:$4 sm:$0xff]   ;;  %v6493_v15 = vld [vmem:[#allocation6 + $0xee0] ss:$16 sps:$4 sm:$0xff]  }
 0x210   :  { %3561 = vmatpush1.bf16.msra.mxu0 %v6402_v17  ;;  %3889 = vmatpush1.bf16.msra.mxu1 %v6405_v18  ;;  %v6496_v17 = vld [vmem:[#allocation6 + $0xee8] ss:$16 sps:$4 sm:$0xff]   ;;  %v6501_v18 = vld [vmem:[#allocation6 + $0xf04] ss:$16 sps:$4 sm:$0xff]  }
 0x211   :  { %3562 = vmatprep.subr.bf16.mxu0 %v6410_v19  ;;  %3890 = vmatprep.subr.bf16.mxu1 %v6413_v20  ;;  %v6504_v19 = vld [vmem:[#allocation6 + $0xf0c] ss:$16 sps:$4 sm:$0xff]   ;;  %v6499_v20 = vld [vmem:[#allocation6 + $0xf00] ss:$16 sps:$4 sm:$0xff]  }
 0x214   :  { %3563 = vmatpush1.bf16.msra.mxu0 %v6408_v53  ;;  %3891 = vmatpush1.bf16.msra.mxu1 %v6411_v21  ;;  %v6502_v53 = vld [vmem:[#allocation6 + $0xf08] ss:$16 sps:$4 sm:$0xff]   ;;  %v6507_v21 = vld [vmem:[#allocation6 + $0xf24] ss:$16 sps:$4 sm:$0xff]  }
 0x215   :  { %3564 = vmatprep.subr.bf16.mxu0 %v6416_v23  ;;  %3892 = vmatprep.subr.bf16.mxu1 %v6419_v24  ;;  %v6510_v23 = vld [vmem:[#allocation6 + $0xf2c] ss:$16 sps:$4 sm:$0xff]   ;;  %v6505_v24 = vld [vmem:[#allocation6 + $0xf20] ss:$16 sps:$4 sm:$0xff]  }
 0x218   :  { %3565 = vmatpush1.bf16.msra.mxu0 %v6414_v25  ;;  %3893 = vmatpush1.bf16.msra.mxu1 %v6417_v27  ;;  %v6508_v25 = vld [vmem:[#allocation6 + $0xf28] ss:$16 sps:$4 sm:$0xff]   ;;  %v6513_v27 = vld [vmem:[#allocation6 + $0xf44] ss:$16 sps:$4 sm:$0xff]  }
 0x219   :  { %3566 = vmatprep.subr.bf16.mxu0 %v6422_v29  ;;  %3894 = vmatprep.subr.bf16.mxu1 %v6425_v14  ;;  %v6516_v29 = vld [vmem:[#allocation6 + $0xf4c] ss:$16 sps:$4 sm:$0xff]   ;;  %v6511_v14 = vld [vmem:[#allocation6 + $0xf40] ss:$16 sps:$4 sm:$0xff]  }
 0x21c   :  { %3567 = vmatpush1.bf16.msra.mxu0 %v6420_v30  ;;  %3895 = vmatpush1.bf16.msra.mxu1 %v6423_v31  ;;  %v6514_v30 = vld [vmem:[#allocation6 + $0xf48] ss:$16 sps:$4 sm:$0xff]   ;;  %v6519_v31 = vld [vmem:[#allocation6 + $0xf64] ss:$16 sps:$4 sm:$0xff]  }
 0x21d   :  { %3568 = vmatprep.subr.bf16.mxu0 %v6428_v32  ;;  %3896 = vmatprep.subr.bf16.mxu1 %v6431_v33  ;;  %v6522_v32 = vld [vmem:[#allocation6 + $0xf6c] ss:$16 sps:$4 sm:$0xff]   ;;  %v6517_v33 = vld [vmem:[#allocation6 + $0xf60] ss:$16 sps:$4 sm:$0xff]  }
 0x220   :  { %3569 = vmatpush1.bf16.msra.mxu0 %v6426_v16  ;;  %3897 = vmatpush1.bf16.msra.mxu1 %v6429_v34  ;;  %v6520_v16 = vld [vmem:[#allocation6 + $0xf68] ss:$16 sps:$4 sm:$0xff]   ;;  %v6525_v34 = vld [vmem:[#allocation6 + $0xf84] ss:$16 sps:$4 sm:$0xff]  }
 0x221   :  { %3570 = vmatprep.subr.bf16.mxu0 %v6434_v35  ;;  %3898 = vmatprep.subr.bf16.mxu1 %v6437_v36  ;;  %v6528_v35 = vld [vmem:[#allocation6 + $0xf8c] ss:$16 sps:$4 sm:$0xff]   ;;  %v6523_v36 = vld [vmem:[#allocation6 + $0xf80] ss:$16 sps:$4 sm:$0xff]  }
 0x224   :  { %3571 = vmatpush1.bf16.msra.mxu0 %v6432_v38  ;;  %3899 = vmatpush1.bf16.msra.mxu1 %v6435_v28  ;;  %v6526_v38 = vld [vmem:[#allocation6 + $0xf88] ss:$16 sps:$4 sm:$0xff]   ;;  %v6531_v28 = vld [vmem:[#allocation6 + $0xfa4] ss:$16 sps:$4 sm:$0xff]  }
 0x225   :  { %3572 = vmatprep.subr.bf16.mxu0 %v6440_v40  ;;  %3900 = vmatprep.subr.bf16.mxu1 %v6443_v41  ;;  %v6534_v40 = vld [vmem:[#allocation6 + $0xfac] ss:$16 sps:$4 sm:$0xff]   ;;  %v6529_v41 = vld [vmem:[#allocation6 + $0xfa0] ss:$16 sps:$4 sm:$0xff]  }
 0x228   :  { %3573 = vmatpush1.bf16.msra.mxu0 %v6438_v42  ;;  %3901 = vmatpush1.bf16.msra.mxu1 %v6441_v22  ;;  %v6532_v42 = vld [vmem:[#allocation6 + $0xfa8] ss:$16 sps:$4 sm:$0xff]   ;;  %v6537_v22 = vld [vmem:[#allocation6 + $0xfc4] ss:$16 sps:$4 sm:$0xff]  }
 0x229   :  { %3574 = vmatprep.subr.bf16.mxu0 %v6446_v43  ;;  %3902 = vmatprep.subr.bf16.mxu1 %v6449_v45  ;;  %v6540_v43 = vld [vmem:[#allocation6 + $0xfcc] ss:$16 sps:$4 sm:$0xff]   ;;  %v6535_v45 = vld [vmem:[#allocation6 + $0xfc0] ss:$16 sps:$4 sm:$0xff]  }
 0x22c   :  { %3575 = vmatpush1.bf16.msra.mxu0 %v6444_v46  ;;  %3903 = vmatpush1.bf16.msra.mxu1 %v6447_v47  ;;  %v6538_v46 = vld [vmem:[#allocation6 + $0xfc8] ss:$16 sps:$4 sm:$0xff]   ;;  %v6543_v47 = vld [vmem:[#allocation6 + $0xfe4] ss:$16 sps:$4 sm:$0xff]  }
 0x22d   :  { %3585 = vmatprep.subr.bf16.mxu0 %v6453_v26  ;;  %3913 = vmatprep.subr.bf16.mxu1 %v6456_v48  ;;  %v6546_v26 = vld [vmem:[#allocation6 + $0xfec] ss:$16 sps:$4 sm:$0xff]   ;;  %v6541_v48 = vld [vmem:[#allocation6 + $0xfe0] ss:$16 sps:$4 sm:$0xff]  }
 0x22f   :  { %3577 = vmatmul.mubr.bf16.vlgmr.msra.gmra.mrb[0].mxu0 %v7076_v51  ;;  %3905 = vmatmul.mubr.bf16.vlgmr.msra.gmra.mrb[0].mxu1 %v7076_v51 }
 0x230   :  { %3586 = vmatpush1.bf16.msra.mxu0 %v6451_v52  ;;  %3914 = vmatpush1.bf16.msra.mxu1 %v6454_v54  ;;  %v6544_v52 = vld [vmem:[#allocation6 + $0xfe8] ss:$16 sps:$4 sm:$0xff]  }
 0x231   :  { %3587 = vmatprep.subr.bf16.mxu0 %v6459_v37  ;;  %3915 = vmatprep.subr.bf16.mxu1 %v6462_v55  ;;  %v6549_v54 = vld [vmem:[#allocation9 + $0x4] ss:$16 sps:$4 sm:$0xff]   ;;  %v6552_v37 = vld [vmem:[#allocation9 + $0xc] ss:$16 sps:$4 sm:$0xff]   ;;  %v719_v55 = vcombine.high %v7076_v51, %v7076_v51  ;;  %v6559_v51 = vld [vmem:[#allocation9 + $0x40] ss:$16 sps:$4 sm:$0xff]  }
 0x232   :  { %3617 = vmatprep.mubr.bf16.mxu0 %v721_v56  ;;  %3945 = vmatprep.mubr.bf16.mxu1 %v721_v56  ;;  %v6547_v56 = vld [vmem:[#allocation9] ss:$16 sps:$4 sm:$0xff]  }
 0x234   :  { %3588 = vmatpush1.bf16.msra.mxu0 %v6457_v57  ;;  %3916 = vmatpush1.bf16.msra.mxu1 %v6460_v50  ;;  %v6550_v57 = vld [vmem:[#allocation9 + $0x8] ss:$16 sps:$4 sm:$0xff]   ;;  %v6555_v50 = vld [vmem:[#allocation9 + $0x24] ss:$16 sps:$4 sm:$0xff]  }
 0x235   :  { %3589 = vmatprep.subr.bf16.mxu0 %v6465_v39  ;;  %3917 = vmatprep.subr.bf16.mxu1 %v6468_v58  ;;  %v6558_v39 = vld [vmem:[#allocation9 + $0x2c] ss:$16 sps:$4 sm:$0xff]   ;;  %v6553_v58 = vld [vmem:[#allocation9 + $0x20] ss:$16 sps:$4 sm:$0xff]  }
 0x238   :  { %3590 = vmatpush1.bf16.msra.mxu0 %v6463_v59  ;;  %3918 = vmatpush1.bf16.msra.mxu1 %v6466_v60  ;;  %v6556_v59 = vld [vmem:[#allocation9 + $0x28] ss:$16 sps:$4 sm:$0xff]   ;;  %v6561_v60 = vld [vmem:[#allocation9 + $0x44] ss:$16 sps:$4 sm:$0xff]  }
 0x239   :  { %3591 = vmatprep.subr.bf16.mxu0 %v6471_v49  ;;  %3919 = vmatprep.subr.bf16.mxu1 %v6474_v61  ;;  %v6564_v49 = vld [vmem:[#allocation9 + $0x4c] ss:$16 sps:$4 sm:$0xff]   ;;  %v6562_v61 = vld [vmem:[#allocation9 + $0x48] ss:$16 sps:$4 sm:$0xff]  }
 0x23c   :  { %3592 = vmatpush1.bf16.msra.mxu0 %v6469_v62  ;;  %3920 = vmatpush1.bf16.msra.mxu1 %v6472_v63  ;;  %v6567_v62 = vld [vmem:[#allocation9 + $0x64] ss:$16 sps:$4 sm:$0xff]   ;;  %v6570_v63 = vld [vmem:[#allocation9 + $0x6c] ss:$16 sps:$4 sm:$0xff]  }
 0x23d   :  { %3593 = vmatprep.subr.bf16.mxu0 %v6477_v0  ;;  %3921 = vmatprep.subr.bf16.mxu1 %v6480_v1  ;;  %v6565_v0 = vld [vmem:[#allocation9 + $0x60] ss:$16 sps:$4 sm:$0xff]   ;;  %v6568_v1 = vld [vmem:[#allocation9 + $0x68] ss:$16 sps:$4 sm:$0xff]  }
 0x240   :  { %3594 = vmatpush1.bf16.msra.mxu0 %v6475_v2  ;;  %3922 = vmatpush1.bf16.msra.mxu1 %v6478_v3  ;;  %v6573_v2 = vld [vmem:[#allocation9 + $0x84] ss:$16 sps:$4 sm:$0xff]   ;;  %v6576_v3 = vld [vmem:[#allocation9 + $0x8c] ss:$16 sps:$4 sm:$0xff]  }
 0x241   :  { %3595 = vmatprep.subr.bf16.mxu0 %v6483_v4  ;;  %3923 = vmatprep.subr.bf16.mxu1 %v6486_v5  ;;  %v6571_v4 = vld [vmem:[#allocation9 + $0x80] ss:$16 sps:$4 sm:$0xff]   ;;  %v6574_v5 = vld [vmem:[#allocation9 + $0x88] ss:$16 sps:$4 sm:$0xff]  }
 0x244   :  { %3596 = vmatpush1.bf16.msra.mxu0 %v6481_v6  ;;  %3924 = vmatpush1.bf16.msra.mxu1 %v6484_v7  ;;  %v6579_v6 = vld [vmem:[#allocation9 + $0xa4] ss:$16 sps:$4 sm:$0xff]   ;;  %v6582_v7 = vld [vmem:[#allocation9 + $0xac] ss:$16 sps:$4 sm:$0xff]  }
 0x245   :  { %3597 = vmatprep.subr.bf16.mxu0 %v6489_v8  ;;  %3925 = vmatprep.subr.bf16.mxu1 %v6492_v9  ;;  %v6577_v8 = vld [vmem:[#allocation9 + $0xa0] ss:$16 sps:$4 sm:$0xff]   ;;  %v6580_v9 = vld [vmem:[#allocation9 + $0xa8] ss:$16 sps:$4 sm:$0xff]  }
 0x248   :  { %3598 = vmatpush1.bf16.msra.mxu0 %v6487_v10  ;;  %3926 = vmatpush1.bf16.msra.mxu1 %v6490_v11  ;;  %v6585_v10 = vld [vmem:[#allocation9 + $0xc4] ss:$16 sps:$4 sm:$0xff]   ;;  %v6588_v11 = vld [vmem:[#allocation9 + $0xcc] ss:$16 sps:$4 sm:$0xff]  }
 0x249   :  { %3599 = vmatprep.subr.bf16.mxu0 %v6495_v12  ;;  %3927 = vmatprep.subr.bf16.mxu1 %v6498_v13  ;;  %v6583_v12 = vld [vmem:[#allocation9 + $0xc0] ss:$16 sps:$4 sm:$0xff]   ;;  %v6586_v13 = vld [vmem:[#allocation9 + $0xc8] ss:$16 sps:$4 sm:$0xff]  }
 0x24c   :  { %3600 = vmatpush1.bf16.msra.mxu0 %v6493_v15  ;;  %3928 = vmatpush1.bf16.msra.mxu1 %v6496_v17  ;;  %v6591_v15 = vld [vmem:[#allocation9 + $0xe4] ss:$16 sps:$4 sm:$0xff]   ;;  %v6594_v17 = vld [vmem:[#allocation9 + $0xec] ss:$16 sps:$4 sm:$0xff]  }
 0x24d   :  { %3601 = vmatprep.subr.bf16.mxu0 %v6501_v18  ;;  %3929 = vmatprep.subr.bf16.mxu1 %v6504_v19  ;;  %v6589_v18 = vld [vmem:[#allocation9 + $0xe0] ss:$16 sps:$4 sm:$0xff]   ;;  %v6592_v19 = vld [vmem:[#allocation9 + $0xe8] ss:$16 sps:$4 sm:$0xff]  }
 0x250   :  { %3602 = vmatpush1.bf16.msra.mxu0 %v6499_v20  ;;  %3930 = vmatpush1.bf16.msra.mxu1 %v6502_v53  ;;  %v6597_v20 = vld [vmem:[#allocation9 + $0x104] ss:$16 sps:$4 sm:$0xff]   ;;  %v6600_v53 = vld [vmem:[#allocation9 + $0x10c] ss:$16 sps:$4 sm:$0xff]  }
 0x251   :  { %3603 = vmatprep.subr.bf16.mxu0 %v6507_v21  ;;  %3931 = vmatprep.subr.bf16.mxu1 %v6510_v23  ;;  %v6595_v21 = vld [vmem:[#allocation9 + $0x100] ss:$16 sps:$4 sm:$0xff]   ;;  %v6598_v23 = vld [vmem:[#allocation9 + $0x108] ss:$16 sps:$4 sm:$0xff]  }
 0x254   :  { %3604 = vmatpush1.bf16.msra.mxu0 %v6505_v24  ;;  %3932 = vmatpush1.bf16.msra.mxu1 %v6508_v25  ;;  %v6603_v24 = vld [vmem:[#allocation9 + $0x124] ss:$16 sps:$4 sm:$0xff]   ;;  %v6606_v25 = vld [vmem:[#allocation9 + $0x12c] ss:$16 sps:$4 sm:$0xff]  }
 0x255   :  { %3605 = vmatprep.subr.bf16.mxu0 %v6513_v27  ;;  %3933 = vmatprep.subr.bf16.mxu1 %v6516_v29  ;;  %v6601_v27 = vld [vmem:[#allocation9 + $0x120] ss:$16 sps:$4 sm:$0xff]   ;;  %v6604_v29 = vld [vmem:[#allocation9 + $0x128] ss:$16 sps:$4 sm:$0xff]  }
 0x258   :  { %3606 = vmatpush1.bf16.msra.mxu0 %v6511_v14  ;;  %3934 = vmatpush1.bf16.msra.mxu1 %v6514_v30  ;;  %v6609_v14 = vld [vmem:[#allocation9 + $0x144] ss:$16 sps:$4 sm:$0xff]   ;;  %v6612_v30 = vld [vmem:[#allocation9 + $0x14c] ss:$16 sps:$4 sm:$0xff]  }
 0x259   :  { %3607 = vmatprep.subr.bf16.mxu0 %v6519_v31  ;;  %3935 = vmatprep.subr.bf16.mxu1 %v6522_v32  ;;  %v6607_v31 = vld [vmem:[#allocation9 + $0x140] ss:$16 sps:$4 sm:$0xff]   ;;  %v6610_v32 = vld [vmem:[#allocation9 + $0x148] ss:$16 sps:$4 sm:$0xff]  }
 0x25c   :  { %3608 = vmatpush1.bf16.msra.mxu0 %v6517_v33  ;;  %3936 = vmatpush1.bf16.msra.mxu1 %v6520_v16  ;;  %v6615_v33 = vld [vmem:[#allocation9 + $0x164] ss:$16 sps:$4 sm:$0xff]   ;;  %v6618_v16 = vld [vmem:[#allocation9 + $0x16c] ss:$16 sps:$4 sm:$0xff]  }
 0x25d   :  { %3609 = vmatprep.subr.bf16.mxu0 %v6525_v34  ;;  %3937 = vmatprep.subr.bf16.mxu1 %v6528_v35  ;;  %v6613_v34 = vld [vmem:[#allocation9 + $0x160] ss:$16 sps:$4 sm:$0xff]   ;;  %v6616_v35 = vld [vmem:[#allocation9 + $0x168] ss:$16 sps:$4 sm:$0xff]  }
 0x260   :  { %3610 = vmatpush1.bf16.msra.mxu0 %v6523_v36  ;;  %3938 = vmatpush1.bf16.msra.mxu1 %v6526_v38  ;;  %v6621_v36 = vld [vmem:[#allocation9 + $0x184] ss:$16 sps:$4 sm:$0xff]   ;;  %v6624_v38 = vld [vmem:[#allocation9 + $0x18c] ss:$16 sps:$4 sm:$0xff]  }
 0x261   :  { %3611 = vmatprep.subr.bf16.mxu0 %v6531_v28  ;;  %3939 = vmatprep.subr.bf16.mxu1 %v6534_v40  ;;  %v6619_v28 = vld [vmem:[#allocation9 + $0x180] ss:$16 sps:$4 sm:$0xff]   ;;  %v6622_v40 = vld [vmem:[#allocation9 + $0x188] ss:$16 sps:$4 sm:$0xff]  }
 0x264   :  { %3612 = vmatpush1.bf16.msra.mxu0 %v6529_v41  ;;  %3940 = vmatpush1.bf16.msra.mxu1 %v6532_v42  ;;  %v6627_v41 = vld [vmem:[#allocation9 + $0x1a4] ss:$16 sps:$4 sm:$0xff]   ;;  %v6630_v42 = vld [vmem:[#allocation9 + $0x1ac] ss:$16 sps:$4 sm:$0xff]  }
 0x265   :  { %3613 = vmatprep.subr.bf16.mxu0 %v6537_v22  ;;  %3941 = vmatprep.subr.bf16.mxu1 %v6540_v43  ;;  %v6625_v22 = vld [vmem:[#allocation9 + $0x1a0] ss:$16 sps:$4 sm:$0xff]   ;;  %v6628_v43 = vld [vmem:[#allocation9 + $0x1a8] ss:$16 sps:$4 sm:$0xff]  }
 0x268   :  { %3614 = vmatpush1.bf16.msra.mxu0 %v6535_v45  ;;  %3942 = vmatpush1.bf16.msra.mxu1 %v6538_v46  ;;  %v6633_v45 = vld [vmem:[#allocation9 + $0x1c4] ss:$16 sps:$4 sm:$0xff]   ;;  %v6636_v46 = vld [vmem:[#allocation9 + $0x1cc] ss:$16 sps:$4 sm:$0xff]  }
 0x269   :  { %3615 = vmatprep.subr.bf16.mxu0 %v6543_v47  ;;  %3943 = vmatprep.subr.bf16.mxu1 %v6546_v26  ;;  %v6631_v47 = vld [vmem:[#allocation9 + $0x1c0] ss:$16 sps:$4 sm:$0xff]   ;;  %v6634_v26 = vld [vmem:[#allocation9 + $0x1c8] ss:$16 sps:$4 sm:$0xff]  }
 0x26c   :  { %3616 = vmatpush1.bf16.msra.mxu0 %v6541_v48  ;;  %3944 = vmatpush1.bf16.msra.mxu1 %v6544_v52  ;;  %v6639_v48 = vld [vmem:[#allocation9 + $0x1e4] ss:$16 sps:$4 sm:$0xff]   ;;  %v6637_v52 = vld [vmem:[#allocation9 + $0x1e0] ss:$16 sps:$4 sm:$0xff]  }
 0x26d   :  { %4836 = vmatprep.subr.bf16.mxu0 %v6549_v54  ;;  %4918 = vmatprep.subr.bf16.mxu1 %v6552_v37  ;;  %v6640_v54 = vld [vmem:[#allocation9 + $0x1e8] ss:$16 sps:$4 sm:$0xff]   ;;  %v6642_v37 = vld [vmem:[#allocation9 + $0x1ec] ss:$16 sps:$4 sm:$0xff]  }
 0x26f   :  { %3618 = vmatmul.mubr.bf16.vlgmr.msra.gmra.mrb[0].mxu0 %v719_v55  ;;  %3946 = vmatmul.mubr.bf16.vlgmr.msra.gmra.mrb[0].mxu1 %v719_v55  ;;  %v6645_v55 = vld [vmem:[#allocation9 + $0x204] ss:$16 sps:$4 sm:$0xff]  }
 0x270   :  { %4837 = vmatpush1.bf16.msra.mxu0 %v6547_v56  ;;  %4919 = vmatpush1.bf16.msra.mxu1 %v6550_v57  ;;  %v6648_v56 = vld [vmem:[#allocation9 + $0x20c] ss:$16 sps:$4 sm:$0xff]   ;;  %v6890_v57 = vmov 1983009808  }
 0x271   :  { %4838 = vmatprep.subr.bf16.mxu0 %v6555_v50  ;;  %4920 = vmatprep.subr.bf16.mxu1 %v6558_v39  ;;  %v3961_v50 = vunpack.c.l.s4 %v6890_v57  ;;  %v7085_v39 = vsub.s32 0, %v7006_v44  ;;  %v6684_v57 = vld [vmem:[#allocation9 + $0x2cc] ss:$16 sps:$4 sm:$0xff]  }
 0x274   :  { %4839 = vmatpush1.bf16.msra.mxu0 %v6553_v58  ;;  %4921 = vmatpush1.bf16.msra.mxu1 %v6556_v59  ;;  %v7088_v58 = vsub.s32 1, %v7006_v44  ;;  %v7091_v59 = vsub.s32 2, %v7006_v44 }
 0x275   :  { %4840 = vmatprep.subr.bf16.mxu0 %v6561_v60  ;;  %4922 = vmatprep.subr.bf16.mxu1 %v6564_v49  ;;  %v7094_v60 = vsub.s32 3, %v7006_v44  ;;  %v3982_v49 = vld [vmem:[#allocation8] sm:$0xf] }
 0x278   :  { %4841 = vmatpush1.bf16.msra.mxu0 %v6559_v51  ;;  %4923 = vmatpush1.bf16.msra.mxu1 %v6562_v61  ;;  %v3962_v51 = vunpack.c.0.s8 %v3961_v50  ;;  %v3987_v61 = vrot.slane %v3982_v49, %v7085_v39  ;;  %v6679_v50 = vld [vmem:[#allocation9 + $0x2c0] ss:$16 sps:$4 sm:$0xff]  }
 0x279   :  { %4842 = vmatprep.subr.bf16.mxu0 %v6567_v62  ;;  %4924 = vmatprep.subr.bf16.mxu1 %v6570_v63  ;;  %v3991_v62 = vrot.slane %v3982_v49, %v7088_v58  ;;  %v3995_v63 = vrot.slane %v3982_v49, %v7091_v59 }
 0x27c   :  { %4843 = vmatpush1.bf16.msra.mxu0 %v6565_v0  ;;  %4925 = vmatpush1.bf16.msra.mxu1 %v6568_v1  ;;  %v3999_v0 = vrot.slane %v3982_v49, %v7094_v60  ;;  %v3965_v1 = vsub.s32 %v3962_v51, %v7006_v44  ;;  %v6682_v49 = vld [vmem:[#allocation9 + $0x2c8] ss:$16 sps:$4 sm:$0xff]   ;;  %v6687_v51 = vld [vmem:[#allocation9 + $0x2e4] ss:$16 sps:$4 sm:$0xff]  }
 0x27d   :  { %4844 = vmatprep.subr.bf16.mxu0 %v6573_v2  ;;  %4926 = vmatprep.subr.bf16.mxu1 %v6576_v3  ;;  %v4000_v2 = vcombine.low %v3987_v61, %v3991_v62  ;;  %v6690_v61 = vld [vmem:[#allocation9 + $0x2ec] ss:$16 sps:$4 sm:$0xff]   ;;  %v6685_v62 = vld [vmem:[#allocation9 + $0x2e0] ss:$16 sps:$4 sm:$0xff]  }
 0x27e   :  { %v4001_v3 = vcombine.low %v3995_v63, %v3999_v0  ;;  %v6688_v63 = vld [vmem:[#allocation9 + $0x2e8] ss:$16 sps:$4 sm:$0xff]   ;;  %v6693_v0 = vld [vmem:[#allocation9 + $0x304] ss:$16 sps:$4 sm:$0xff]  }
 0x280   :  { %4845 = vmatpush1.bf16.msra.mxu0 %v6571_v4  ;;  %4927 = vmatpush1.bf16.msra.mxu1 %v6574_v5 }
 0x281   :  { %4846 = vmatprep.subr.bf16.mxu0 %v6579_v6  ;;  %4928 = vmatprep.subr.bf16.mxu1 %v6582_v7  ;;  %v4008_v6 = vrot.slane %v4000_v2, %v3965_v1  ;;  %v4015_v7 = vrot.slane %v4001_v3, %v3965_v1  ;;  %v6691_v2 = vld [vmem:[#allocation9 + $0x300] ss:$16 sps:$4 sm:$0xff]   ;;  %v6694_v3 = vld [vmem:[#allocation9 + $0x308] ss:$16 sps:$4 sm:$0xff]  }
 0x284   :  { %4847 = vmatpush1.bf16.msra.mxu0 %v6577_v8  ;;  %4929 = vmatpush1.bf16.msra.mxu1 %v6580_v9 }
 0x285   :  { %4848 = vmatprep.subr.bf16.mxu0 %v6585_v10  ;;  %4930 = vmatprep.subr.bf16.mxu1 %v6588_v11 }
 0x288   :  { %4849 = vmatpush1.bf16.msra.mxu0 %v6583_v12  ;;  %4931 = vmatpush1.bf16.msra.mxu1 %v6586_v13 }
 0x289   :  { %4850 = vmatprep.subr.bf16.mxu0 %v6591_v15  ;;  %4932 = vmatprep.subr.bf16.mxu1 %v6594_v17 }
 0x28c   :  { %4851 = vmatpush1.bf16.msra.mxu0 %v6589_v18  ;;  %4933 = vmatpush1.bf16.msra.mxu1 %v6592_v19 }
 0x28d   :  { %4852 = vmatprep.subr.bf16.mxu0 %v6597_v20  ;;  %4934 = vmatprep.subr.bf16.mxu1 %v6600_v53  ;;  %v4016_v20 = vcombine.low %v4008_v6, %v4015_v7  ;;  %v6697_v6 = vld [vmem:[#allocation9 + $0x320] ss:$16 sps:$4 sm:$0xff]   ;;  %v6700_v7 = vld [vmem:[#allocation9 + $0x328] ss:$16 sps:$4 sm:$0xff]  }
 0x290   :  { %4853 = vmatpush1.bf16.msra.mxu0 %v6595_v21  ;;  %4935 = vmatpush1.bf16.msra.mxu1 %v6598_v23 }
 0x291   :  { %4854 = vmatprep.subr.bf16.mxu0 %v6603_v24  ;;  %4936 = vmatprep.subr.bf16.mxu1 %v6606_v25 }
 0x294   :  { %4855 = vmatpush1.bf16.msra.mxu0 %v6601_v27  ;;  %4937 = vmatpush1.bf16.msra.mxu1 %v6604_v29 }
 0x295   :  { %4856 = vmatprep.subr.bf16.mxu0 %v6609_v14  ;;  %4938 = vmatprep.subr.bf16.mxu1 %v6612_v30  ;;  %v6643_v14 = vld [vmem:[#allocation9 + $0x200] ss:$16 sps:$4 sm:$0xff]   ;;  %v6646_v30 = vld [vmem:[#allocation9 + $0x208] ss:$16 sps:$4 sm:$0xff]  }
 0x298   :  { %4857 = vmatpush1.bf16.msra.mxu0 %v6607_v31  ;;  %4939 = vmatpush1.bf16.msra.mxu1 %v6610_v32 }
 0x299   :  { %4858 = vmatprep.subr.bf16.mxu0 %v6615_v33  ;;  %4940 = vmatprep.subr.bf16.mxu1 %v6618_v16  ;;  %v6651_v16 = vld [vmem:[#allocation9 + $0x224] ss:$16 sps:$4 sm:$0xff]  }
 0x29c   :  { %4859 = vmatpush1.bf16.msra.mxu0 %v6613_v34  ;;  %4941 = vmatpush1.bf16.msra.mxu1 %v6616_v35  ;;  %v6654_v34 = vld [vmem:[#allocation9 + $0x22c] ss:$16 sps:$4 sm:$0xff]   ;;  %v6649_v35 = vld [vmem:[#allocation9 + $0x220] ss:$16 sps:$4 sm:$0xff]  }
 0x29d   :  { %4860 = vmatprep.subr.bf16.mxu0 %v6621_v36  ;;  %4942 = vmatprep.subr.bf16.mxu1 %v6624_v38  ;;  %v6652_v36 = vld [vmem:[#allocation9 + $0x228] ss:$16 sps:$4 sm:$0xff]   ;;  %v6657_v38 = vld [vmem:[#allocation9 + $0x244] ss:$16 sps:$4 sm:$0xff]  }
 0x2a0   :  { %4861 = vmatpush1.bf16.msra.mxu0 %v6619_v28  ;;  %4943 = vmatpush1.bf16.msra.mxu1 %v6622_v40  ;;  %v6660_v28 = vld [vmem:[#allocation9 + $0x24c] ss:$16 sps:$4 sm:$0xff]   ;;  %v6655_v40 = vld [vmem:[#allocation9 + $0x240] ss:$16 sps:$4 sm:$0xff]  }
 0x2a1   :  { %4862 = vmatprep.subr.bf16.mxu0 %v6627_v41  ;;  %4944 = vmatprep.subr.bf16.mxu1 %v6630_v42  ;;  %v6658_v41 = vld [vmem:[#allocation9 + $0x248] ss:$16 sps:$4 sm:$0xff]   ;;  %v6663_v42 = vld [vmem:[#allocation9 + $0x264] ss:$16 sps:$4 sm:$0xff]  }
 0x2a4   :  { %4863 = vmatpush1.bf16.msra.mxu0 %v6625_v22  ;;  %4945 = vmatpush1.bf16.msra.mxu1 %v6628_v43  ;;  %v6666_v22 = vld [vmem:[#allocation9 + $0x26c] ss:$16 sps:$4 sm:$0xff]   ;;  %v6661_v43 = vld [vmem:[#allocation9 + $0x260] ss:$16 sps:$4 sm:$0xff]  }
 0x2a5   :  { %4864 = vmatprep.subr.bf16.mxu0 %v6633_v45  ;;  %4946 = vmatprep.subr.bf16.mxu1 %v6636_v46  ;;  %v6664_v45 = vld [vmem:[#allocation9 + $0x268] ss:$16 sps:$4 sm:$0xff]   ;;  %v6669_v46 = vld [vmem:[#allocation9 + $0x284] ss:$16 sps:$4 sm:$0xff]  }
 0x2a8   :  { %4865 = vmatpush1.bf16.msra.mxu0 %v6631_v47  ;;  %4947 = vmatpush1.bf16.msra.mxu1 %v6634_v26  ;;  %v6672_v47 = vld [vmem:[#allocation9 + $0x28c] ss:$16 sps:$4 sm:$0xff]   ;;  %v6667_v26 = vld [vmem:[#allocation9 + $0x280] ss:$16 sps:$4 sm:$0xff]  }
 0x2a9   :  { %4866 = vmatprep.subr.bf16.mxu0 %v6639_v48  ;;  %4948 = vmatprep.subr.bf16.mxu1 %v6642_v37  ;;  %v6670_v48 = vld [vmem:[#allocation9 + $0x288] ss:$16 sps:$4 sm:$0xff]   ;;  %v6673_v37 = vld [vmem:[#allocation9 + $0x2a0] ss:$16 sps:$4 sm:$0xff]  }
 0x2ac   :  { %4867 = vmatpush1.bf16.msra.mxu0 %v6637_v52  ;;  %4949 = vmatpush1.bf16.msra.mxu1 %v6640_v54  ;;  %v6675_v52 = vld [vmem:[#allocation9 + $0x2a4] ss:$16 sps:$4 sm:$0xff]   ;;  %v6678_v54 = vld [vmem:[#allocation9 + $0x2ac] ss:$16 sps:$4 sm:$0xff]  }
 0x2ad   :  { %4877 = vmatprep.subr.bf16.mxu0 %v6645_v55  ;;  %4959 = vmatprep.subr.bf16.mxu1 %v6648_v56  ;;  %v6676_v55 = vld [vmem:[#allocation9 + $0x2a8] ss:$16 sps:$4 sm:$0xff]   ;;  %v6681_v56 = vld [vmem:[#allocation9 + $0x2c4] ss:$16 sps:$4 sm:$0xff]  }
 0x342   :  { %v3619_v4 = vpop.f32.mrb[0].mxu0  ;;  %v3947_v5 = vpop.f32.mrb[0].mxu1 }
 0x343   :  { %v3621_v8 = vpop.f32.mrb[1].mxu0  ;;  %v3949_v9 = vpop.f32.mrb[1].mxu1 }
 0x344   :  { %v3958_v10 = vcombine.low %v3619_v4, %v3621_v8  ;;  %v3959_v11 = vcombine.low %v3947_v5, %v3949_v9  ;;  %v3623_v12 = vpop.f32.mrb[2].mxu0  ;;  %v3951_v13 = vpop.f32.mrb[2].mxu1  ;;  %v6699_v4 = vld [vmem:[#allocation9 + $0x324] ss:$16 sps:$4 sm:$0xff]   ;;  %v6702_v5 = vld [vmem:[#allocation9 + $0x32c] ss:$16 sps:$4 sm:$0xff]  }
 0x345   :  { %v3624_v15 = vpop.f32.mrb[3].mxu0  ;;  %v3952_v17 = vpop.f32.mrb[3].mxu1  ;;  %v6705_v8 = vld [vmem:[#allocation9 + $0x344] ss:$16 sps:$4 sm:$0xff]   ;;  %v6708_v9 = vld [vmem:[#allocation9 + $0x34c] ss:$16 sps:$4 sm:$0xff]  }
 0x346   :  { %v3966_v18 = vrot.slane %v3958_v10, %v3965_v1  ;;  %v3973_v19 = vrot.slane %v3959_v11, %v3965_v1  ;;  %v6703_v10 = vld [vmem:[#allocation9 + $0x340] ss:$16 sps:$4 sm:$0xff]   ;;  %v6706_v11 = vld [vmem:[#allocation9 + $0x348] ss:$16 sps:$4 sm:$0xff]   ;;  %v6711_v12 = vld [vmem:[#allocation9 + $0x364] ss:$16 sps:$4 sm:$0xff]  }
 0x347   :  { %v6714_v13 = vld [vmem:[#allocation9 + $0x36c] ss:$16 sps:$4 sm:$0xff]   ;;  %v6709_v15 = vld [vmem:[#allocation9 + $0x360] ss:$16 sps:$4 sm:$0xff]   ;;  %v6712_v17 = vld [vmem:[#allocation9 + $0x368] ss:$16 sps:$4 sm:$0xff]  }
 0x348   :  { %v3974_v53 = vcombine.low %v3966_v18, %v3973_v19  ;;  %v6717_v18 = vld [vmem:[#allocation9 + $0x384] ss:$16 sps:$4 sm:$0xff]   ;;  %v6720_v19 = vld [vmem:[#allocation9 + $0x38c] ss:$16 sps:$4 sm:$0xff]  }
 0x34a   :  { %v4018_v21 = vadd.f32 %v4016_v20, %v3974_v53  ;;  %v6715_v20 = vld [vmem:[#allocation9 + $0x380] ss:$16 sps:$4 sm:$0xff]   ;;  %v6718_v53 = vld [vmem:[#allocation9 + $0x388] ss:$16 sps:$4 sm:$0xff]  }
 0x34c   :  { %v4019_v44 = vmax.f32 %v4018_v21, 0.0  ;;  %v6723_v21 = vld [vmem:[#allocation9 + $0x3a4] ss:$16 sps:$4 sm:$0xff]  }
 0x34e   :  { %v4028_v23 = vrot.slane %v4019_v44, %v3965_v1  ;;  %v4021_v24 = vcombine.high %v4019_v44, %v4019_v44  ;;  %v6726_v44 = vld [vmem:[#allocation9 + $0x3ac] ss:$16 sps:$4 sm:$0xff]  }
 0x350   :  { %v4036_v25 = vcombine.high %v4028_v23, %v4028_v23  ;;  %v7101_v27 = vrot.slane %v4021_v24, %v3965_v1  ;;  %v4042_v32 = vpack.c.bf16 %v4028_v23, %v4028_v23  ;;  %v6696_v1 = vld [vmem:[#allocation9 + $0x30c] ss:$16 sps:$4 sm:$0xff]   ;;  %v6721_v23 = vld [vmem:[#allocation9 + $0x3a0] ss:$16 sps:$4 sm:$0xff]   ;;  %v6724_v24 = vld [vmem:[#allocation9 + $0x3a8] ss:$16 sps:$4 sm:$0xff]  }
 0x352   :  { %v4043_v29 = vpack.c.bf16 %v4036_v25, %v4036_v25  ;;  %v4037_v31 = vcombine.high %v7101_v27, %v7101_v27  ;;  %v6729_v25 = vld [vmem:[#allocation9 + $0x3c4] ss:$16 sps:$4 sm:$0xff]  }
 0x354   :  { %4868 = vmatprep.mubr.bf16.mxu0 %v4043_v29  ;;  %4950 = vmatprep.mubr.bf16.mxu1 %v4043_v29  ;;  %v4045_v33 = vpack.c.bf16 %v4037_v31, %v4037_v31  ;;  %v6732_v29 = vld [vmem:[#allocation9 + $0x3cc] ss:$16 sps:$4 sm:$0xff]   ;;  %v6735_v31 = vld [vmem:[#allocation9 + $0x3e4] ss:$16 sps:$4 sm:$0xff]  }
 0x355   :  { %4869 = vmatmul.mubr.bf16.vlgmr.msra.gmra.mrb[4].mxu0 %v4042_v32  ;;  %4951 = vmatmul.mubr.bf16.vlgmr.msra.gmra.mrb[4].mxu1 %v4042_v32  ;;  %v6738_v32 = vld [vmem:[#allocation9 + $0x3ec] ss:$16 sps:$4 sm:$0xff]  }
 0x356   :  { %4878 = vmatpush1.bf16.msra.mxu0 %v6643_v14  ;;  %4960 = vmatpush1.bf16.msra.mxu1 %v6646_v30  ;;  %v6727_v14 = vld [vmem:[#allocation9 + $0x3c0] ss:$16 sps:$4 sm:$0xff]   ;;  %v6730_v30 = vld [vmem:[#allocation9 + $0x3c8] ss:$16 sps:$4 sm:$0xff]  }
 0x357   :  { %4909 = vmatprep.mubr.bf16.mxu0 %v4045_v33  ;;  %4991 = vmatprep.mubr.bf16.mxu1 %v4045_v33  ;;  %v6733_v33 = vld [vmem:[#allocation9 + $0x3e0] ss:$16 sps:$4 sm:$0xff]  }
 0x358   :  { %4879 = vmatprep.subr.bf16.mxu0 %v6651_v16  ;;  %4961 = vmatprep.subr.bf16.mxu1 %v6654_v34  ;;  %v6736_v16 = vld [vmem:[#allocation9 + $0x3e8] ss:$16 sps:$4 sm:$0xff]   ;;  %v4044_v34 = vpack.c.bf16 %v7101_v27, %v7101_v27 }
 0x35a   :  { %4880 = vmatpush1.bf16.msra.mxu0 %v6649_v35  ;;  %4962 = vmatpush1.bf16.msra.mxu1 %v6652_v36  ;;  %v4174_v35 = vld [vmem:[#allocation11] sm:$0xf] }
 0x35b   :  { %4881 = vmatprep.subr.bf16.mxu0 %v6657_v38  ;;  %4963 = vmatprep.subr.bf16.mxu1 %v6660_v28  ;;  %v4179_v36 = vrot.slane %v4174_v35, %v7085_v39  ;;  %v4187_v38 = vrot.slane %v4174_v35, %v7091_v59  ;;  %v5004_v28 = vld [vmem:[#allocation12] sm:$0xf] }
 0x35e   :  { %4882 = vmatpush1.bf16.msra.mxu0 %v6655_v40  ;;  %4964 = vmatpush1.bf16.msra.mxu1 %v6658_v41  ;;  %v4183_v40 = vrot.slane %v4174_v35, %v7088_v58  ;;  %v4191_v41 = vrot.slane %v4174_v35, %v7094_v60 }
 0x35f   :  { %4883 = vmatprep.subr.bf16.mxu0 %v6663_v42  ;;  %4965 = vmatprep.subr.bf16.mxu1 %v6666_v22 }
 0x362   :  { %4884 = vmatpush1.bf16.msra.mxu0 %v6661_v43  ;;  %4966 = vmatpush1.bf16.msra.mxu1 %v6664_v45  ;;  %v5009_v45 = vrot.slane %v5004_v28, %v7085_v39 }
 0x363   :  { %4885 = vmatprep.subr.bf16.mxu0 %v6669_v46  ;;  %4967 = vmatprep.subr.bf16.mxu1 %v6672_v47 }
 0x366   :  { %4886 = vmatpush1.bf16.msra.mxu0 %v6667_v26  ;;  %4968 = vmatpush1.bf16.msra.mxu1 %v6670_v48  ;;  %v5017_v26 = vrot.slane %v5004_v28, %v7091_v59 }
 0x367   :  { %4887 = vmatprep.subr.bf16.mxu0 %v6675_v52  ;;  %4969 = vmatprep.subr.bf16.mxu1 %v6678_v54  ;;  %v5013_v52 = vrot.slane %v5004_v28, %v7088_v58 }
 0x36a   :  { %4888 = vmatpush1.bf16.msra.mxu0 %v6673_v37  ;;  %4970 = vmatpush1.bf16.msra.mxu1 %v6676_v55 }
 0x36b   :  { %4889 = vmatprep.subr.bf16.mxu0 %v6681_v56  ;;  %4971 = vmatprep.subr.bf16.mxu1 %v6684_v57 }
 0x36e   :  { %4890 = vmatpush1.bf16.msra.mxu0 %v6679_v50  ;;  %4972 = vmatpush1.bf16.msra.mxu1 %v6682_v49 }
 0x36f   :  { %4891 = vmatprep.subr.bf16.mxu0 %v6687_v51  ;;  %4973 = vmatprep.subr.bf16.mxu1 %v6690_v61 }
 0x372   :  { %4892 = vmatpush1.bf16.msra.mxu0 %v6685_v62  ;;  %4974 = vmatpush1.bf16.msra.mxu1 %v6688_v63  ;;  %v5021_v62 = vrot.slane %v5004_v28, %v7094_v60 }
 0x373   :  { %4893 = vmatprep.subr.bf16.mxu0 %v6693_v0  ;;  %4975 = vmatprep.subr.bf16.mxu1 %v6696_v1 }
 0x376   :  { %4894 = vmatpush1.bf16.msra.mxu0 %v6691_v2  ;;  %4976 = vmatpush1.bf16.msra.mxu1 %v6694_v3 }
 0x377   :  { %4895 = vmatprep.subr.bf16.mxu0 %v6699_v4  ;;  %4977 = vmatprep.subr.bf16.mxu1 %v6702_v5 }
 0x37a   :  { %4896 = vmatpush1.bf16.msra.mxu0 %v6697_v6  ;;  %4978 = vmatpush1.bf16.msra.mxu1 %v6700_v7  ;;  %v5698_v7 = vld [vmem:[#allocation3] ss:$0 sm:$0xff] }
 0x37b   :  { %4897 = vmatprep.subr.bf16.mxu0 %v6705_v8  ;;  %4979 = vmatprep.subr.bf16.mxu1 %v6708_v9 }
 0x37e   :  { %4898 = vmatpush1.bf16.msra.mxu0 %v6703_v10  ;;  %4980 = vmatpush1.bf16.msra.mxu1 %v6706_v11 }
 0x37f   :  { %4899 = vmatprep.subr.bf16.mxu0 %v6711_v12  ;;  %4981 = vmatprep.subr.bf16.mxu1 %v6714_v13 }
 0x382   :  { %4900 = vmatpush1.bf16.msra.mxu0 %v6709_v15  ;;  %4982 = vmatpush1.bf16.msra.mxu1 %v6712_v17 }
 0x383   :  { %4901 = vmatprep.subr.bf16.mxu0 %v6717_v18  ;;  %4983 = vmatprep.subr.bf16.mxu1 %v6720_v19 }
 0x386   :  { %4902 = vmatpush1.bf16.msra.mxu0 %v6715_v20  ;;  %4984 = vmatpush1.bf16.msra.mxu1 %v6718_v53 }
 0x387   :  { %4903 = vmatprep.subr.bf16.mxu0 %v6723_v21  ;;  %4985 = vmatprep.subr.bf16.mxu1 %v6726_v44 }
 0x38a   :  { %4904 = vmatpush1.bf16.msra.mxu0 %v6721_v23  ;;  %4986 = vmatpush1.bf16.msra.mxu1 %v6724_v24 }
 0x38b   :  { %4905 = vmatprep.subr.bf16.mxu0 %v6729_v25  ;;  %4987 = vmatprep.subr.bf16.mxu1 %v6732_v29 }
 0x38e   :  { %4906 = vmatpush1.bf16.msra.mxu0 %v6727_v14  ;;  %4988 = vmatpush1.bf16.msra.mxu1 %v6730_v30 }
 0x38f   :  { %4907 = vmatprep.subr.bf16.mxu0 %v6735_v31  ;;  %4989 = vmatprep.subr.bf16.mxu1 %v6738_v32 }
 0x392   :  { %4908 = vmatpush1.bf16.msra.mxu0 %v6733_v33  ;;  %4990 = vmatpush1.bf16.msra.mxu1 %v6736_v16 }
 0x395   :  { %4910 = vmatmul.mubr.bf16.vlgmr.msra.gmra.mrb[4].mxu0 %v4044_v34  ;;  %4992 = vmatmul.mubr.bf16.vlgmr.msra.gmra.mrb[4].mxu1 %v4044_v34 }
 0x468   :  { %v4911_v42 = vpop.f32.mrb[4].mxu0  ;;  %v4993_v22 = vpop.f32.mrb[4].mxu1 }
 0x469   :  { %v5699_v43 = vadd.f32 %v4911_v42, %v4179_v36  ;;  %v5701_v46 = vadd.f32 %v4993_v22, %v4187_v38  ;;  %v4913_v47 = vpop.f32.mrb[5].mxu0  ;;  %v4995_v27 = vpop.f32.mrb[5].mxu1 }
 0x46a   :  { %v5700_v48 = vadd.f32 %v4913_v47, %v4183_v40  ;;  %v5702_v54 = vadd.f32 %v4995_v27, %v4191_v41  ;;  %v4915_v37 = vpop.f32.mrb[6].mxu0  ;;  %v4997_v55 = vpop.f32.mrb[6].mxu1 }
 0x46b   :  { %v5000_v56 = vmax.f32 %v5699_v43, 0.0  ;;  %v5002_v57 = vmax.f32 %v5701_v46, 0.0  ;;  %v4916_v50 = vpop.f32.mrb[7].mxu0  ;;  %v4998_v49 = vpop.f32.mrb[7].mxu1 }
 0x46c   :  { %v5001_v51 = vmax.f32 %v5700_v48, 0.0  ;;  %v5003_v61 = vmax.f32 %v5702_v54, 0.0 }
 0x46d   :  { %v5026_v39 = vmul.f32 %v5009_v45, %v5000_v56  ;;  %v5028_v63 = vmul.f32 %v5017_v26, %v5002_v57 }
 0x46e   :  { %v5027_v0 = vmul.f32 %v5013_v52, %v5001_v51  ;;  %v5029_v59 = vmul.f32 %v5021_v62, %v5003_v61 }
 0x46f   :  { %v5031_v1 = vsel %vm5030_vm0, %v5026_v39, 0.0  ;;  %v5034_v58 = vsel %vm5030_vm0, %v5028_v63, 0.0 }
 0x470   :  { %v5032_v2 = vsel %vm5030_vm0, %v5027_v0, 0.0  ;;  %v5036_v5 = vsel %vm5030_vm0, %v5029_v59, 0.0 }
 0x471   :  { %v5033_v3 = vadd.f32 %v5032_v2, %v5031_v1 }
 0x473   :  { %v5035_v4 = vadd.f32 %v5034_v58, %v5033_v3 }
 0x475   :  { %v5037_v6 = vadd.f32 %v5036_v5, %v5035_v4 }
 0x477   :  { %5038 = vadd.xlane.f32.xlu0 %v5037_v6 }
 0x504   :  { %v5039_v8 = vpop.xlane.xlu0 %5038 }
 0x505   :  { %v5047_v9 = vadd.f32 %v5698_v7, %v5039_v8 }
 0x507   :  { %5049 = vst.msk [vmem:[%s7125_s7] sm:$0x3] %vm5048_vm1, %v5047_v9 }
 0x508   :  { %5054 = vsyncpa [#allocation5], 1 }
 0x509   :  { %5055 = vsyncpa [#allocation7], 1 }
 0x50a   :  { %5056 = vsyncpa [#allocation10], 1 }
 0x50b   :  { %5057 = vsyncpa [#allocation13], 1 }

</bundles_post_ra>
